<compile_context>
chip_gen: v7x
topology: tpu7x:2x2x1
jax: 0.10.0
libtpu: 0.0.40
codegen_flags: <defaults>
</compile_context>

<pallas_src>
import functools

import jax
import jax.numpy as jnp
from jax import lax
from jax.experimental import pallas as pl
from jax.experimental.pallas import tpu as pltpu


def _leapfrog_kernel(z_ref, x_ref, m_ref, a_ref,
                     draw_ref, u_ref, acc_ref,
                     *, num_steps, step_size, num_chunks):
    """One batch-block of the full leapfrog trajectory + Metropolis step.

    z_ref    : SMEM (1,)     f32      -- single uniform draw (scalar prefetch)
    x_ref    : VMEM (TB, D)  f32      -- previousSample block
    m_ref    : VMEM (TB, D)  f32      -- initial momentum ~ N(0, I)
    a_ref    : VMEM (D, D)   bf16/f32 -- precision matrix (resident across grid)
    draw_ref : VMEM (TB, D)  f32      -- draw_final block
    u_ref    : VMEM (TB, 1)  f32      -- U_final (energy at proposed position)
    acc_ref  : VMEM (TB, 1)  f32      -- per-sample accept flag (mean in wrapper)

    The TB rows are split into `num_chunks` independent row sub-chunks so the
    MXU matmul (grad) of one chunk can overlap with the VPU momentum/position
    update (and bf16 cast) of the other chunk within each leapfrog step.
    """
    TB, D = x_ref.shape
    nc = num_chunks
    C = TB // nc
    eps = jnp.float32(step_size)
    half_eps = jnp.float32(0.5 * step_size)

    def rows(c):
        return slice(c * C, (c + 1) * C)

    def grad(x):
        # d/dx [0.5 x A x^T] = x @ A  (A symmetric). MXU matmul, f32 accumulation.
        return jnp.dot(x.astype(a_ref.dtype), a_ref[...],
                       preferred_element_type=jnp.float32)

    def potential(x, g):
        # 0.5 * x . (x @ A), reusing an already computed gradient (no matmul).
        return 0.5 * jnp.sum(x * g, axis=1, keepdims=True)      # (C, 1)

    def kinetic(m):
        return 0.5 * jnp.sum(m * m, axis=1, keepdims=True)      # (C, 1)

    # prev_U, gradient = energy_function(previousSample); prev_K = 0.5*sum(M^2).
    # NOTE: x0 is NOT kept live across the trajectory; it is re-read from the
    # resident x_ref block only at the end (cuts vreg spills).
    xs = tuple(x_ref[rows(c), :] for c in range(nc))
    ms = tuple(m_ref[rows(c), :] for c in range(nc))
    gs = tuple(grad(xs[c]) for c in range(nc))
    prev_u = tuple(potential(xs[c], gs[c]) for c in range(nc))
    prev_k = tuple(kinetic(ms[c]) for c in range(nc))

    # Half momentum step + first position step + gradient at the new position.
    ms = tuple(ms[c] - half_eps * gs[c] for c in range(nc))
    xs = tuple(xs[c] + eps * ms[c] for c in range(nc))
    gs = tuple(grad(xs[c]) for c in range(nc))

    # Remaining (numSteps - 1) full leapfrog steps.  Per-chunk chains are
    # independent inside the body, so the scheduler overlaps chunk k's matmul
    # with chunk k+1's VPU updates.
    def body(_, carry):
        xs, ms, gs = carry
        ms = tuple(ms[c] - eps * gs[c] for c in range(nc))
        xs = tuple(xs[c] + eps * ms[c] for c in range(nc))
        gs = tuple(grad(xs[c]) for c in range(nc))
        return (xs, ms, gs)

    xs, ms, gs = lax.fori_loop(1, num_steps, body, (xs, ms, gs),
                               unroll=(num_steps <= 8))

    # Final half momentum step.  The momentum flip (m = -m) is a no-op for the
    # outputs (K uses m**2; m is not returned), so it is skipped.  The module's
    # final energy_function call is also redundant: current_U only needs x and
    # the gradient already produced by the last leapfrog step.
    ms = tuple(ms[c] - half_eps * gs[c] for c in range(nc))

    z = z_ref[0]
    one = jnp.float32(1.0)
    for c in range(nc):
        cur_u = potential(xs[c], gs[c])
        cur_k = kinetic(ms[c])
        log_h = prev_u[c] + prev_k[c] - cur_u - cur_k            # (C, 1)
        criterion = jnp.minimum(one, jnp.exp(log_h))
        accept = z < criterion                                   # (C, 1) bool

        # draw_final[Z >= criterion] = previousSample[Z >= criterion]
        x0c = x_ref[rows(c), :]                                  # re-read, not kept live
        draw_ref[rows(c), :] = jnp.where(accept, xs[c], x0c)
        # U_final is the energy at the *proposed* position (even for rejected
        # rows), exactly as in the PyTorch module (U_final = current_U).
        u_ref[rows(c), :] = cur_u
        acc_ref[rows(c), :] = accept.astype(jnp.float32)


def _choose_tb(B, D, a_itemsize):
    """Pick rows-per-block TB and return (TB, VMEM working-set bytes).

    Goals: fill the MXU M dimension for large batches, keep >= 2 grid blocks
    whenever B allows it (v7x has 2 TensorCores to shard the "parallel" batch
    axis across), and keep the pipeline's double-buffered working set inside a
    conservative VMEM budget (v7x: 64 MiB physical).
    """
    def working_set(tb):
        return (2 * D * D * a_itemsize           # A (constant index_map, 2 pipeline buffers)
                + (2 + 2 + 2) * tb * D * 4       # x, m, draw (double-buffered)
                + 2 * 2 * tb * 128 * 4)          # u, acc blocks (lane-padded tiles)

    if B >= 256:
        tb = 512 if B >= 1024 else (256 if B >= 512 else 128)
    elif B > 16:
        tb = -(-B // 2)                          # two blocks even for small batches
        tb = -(-tb // 16) * 16                   # block rows: multiple of 16
    else:
        tb = 16                                  # single tiny (padded) block
    while tb > 16 and working_set(tb) > 40 * 2**20:
        tb = max(16, (tb // 2) // 16 * 16)       # shrink, stay a multiple of 16
    return tb, working_set(tb)


def leapfrog_regular(previous_sample, precision, mntm, z, *,
                     num_steps, step_size, matmul_dtype=jnp.bfloat16):
    """Wrapper mirroring Leapfrog_Regular.forward -> (draw_final, U_final, acceptance)."""
    B, D = previous_sample.shape
    a_mm = precision.astype(matmul_dtype)        # cast A once, outside the kernel
    a_itemsize = jnp.dtype(matmul_dtype).itemsize

    TB, working_set = _choose_tb(B, D, a_itemsize)
    B_pad = -(-B // TB) * TB
    x_in = previous_sample.astype(jnp.float32)
    m_in = mntm.astype(jnp.float32)
    if B_pad != B:
        # Zero-pad so every block is full and the grid keeps >= 2 parallel
        # blocks; padded rows are dropped below (they never affect real rows).
        pad = ((0, B_pad - B), (0, 0))
        x_in = jnp.pad(x_in, pad)
        m_in = jnp.pad(m_in, pad)
    G = B_pad // TB

    # Two independent row sub-chunks per block for MXU/VPU overlap.
    num_chunks = 2 if TB % 16 == 0 else 1

    kernel = functools.partial(_leapfrog_kernel, num_steps=num_steps,
                               step_size=step_size, num_chunks=num_chunks)

    grid_spec = pltpu.PrefetchScalarGridSpec(
        num_scalar_prefetch=1,                    # z -> SMEM, shared by all blocks
        grid=(G,),
        in_specs=[
            pl.BlockSpec((TB, D), lambda i, z: (i, 0)),   # previousSample
            pl.BlockSpec((TB, D), lambda i, z: (i, 0)),   # momentum
            pl.BlockSpec((D, D), lambda i, z: (0, 0)),    # A: resident in VMEM
        ],
        out_specs=(
            pl.BlockSpec((TB, D), lambda i, z: (i, 0)),   # draw_final
            pl.BlockSpec((TB, 1), lambda i, z: (i, 0)),   # U_final
            pl.BlockSpec((TB, 1), lambda i, z: (i, 0)),   # accept flags
        ),
    )

    # Explicit VMEM budget: working set + headroom, floor 32 MiB, cap 48 MiB
    # (inside v7x's 64 MiB physical VMEM; raises v5e's 16 MiB scoped default).
    vmem_limit = int(min(48 * 2**20,
                         max(32 * 2**20, 1.25 * working_set + (4 << 20))))

    draw, u_final, acc = pl.pallas_call(
        kernel,
        out_shape=(
            jax.ShapeDtypeStruct((B_pad, D), jnp.float32),
            jax.ShapeDtypeStruct((B_pad, 1), jnp.float32),
            jax.ShapeDtypeStruct((B_pad, 1), jnp.float32),
        ),
        grid_spec=grid_spec,
        compiler_params=pltpu.CompilerParams(
            dimension_semantics=("parallel",),    # shard batch blocks across TCs
            vmem_limit_bytes=vmem_limit),
    )(z, x_in, m_in, a_mm)

    draw_final = draw[:B]
    u_out = u_final[:B, 0]
    acceptance = jnp.mean(acc[:B, 0])             # mean(Z < criterion), as in the module
    return draw_final, u_out, acceptance


def _leapfrog_reference(x0, A, m0, z, *, num_steps, step_size):
    """Pure-jnp f32 reference of the module's forward (for a sanity check)."""
    eps = jnp.float32(step_size)
    grad = lambda x: x @ A
    g = grad(x0)
    prev_u = 0.5 * jnp.sum(x0 * g, axis=1)
    prev_k = 0.5 * jnp.sum(m0 * m0, axis=1)
    m = m0 - 0.5 * eps * g
    x = x0 + eps * m
    g = grad(x)
    for _ in range(1, num_steps):
        m = m - eps * g
        x = x + eps * m
        g = grad(x)
    m = m - 0.5 * eps * g
    cur_u = 0.5 * jnp.sum(x * g, axis=1)
    cur_k = 0.5 * jnp.sum(m * m, axis=1)
    crit = jnp.minimum(1.0, jnp.exp(prev_u + prev_k - cur_u - cur_k))
    accept = (z[0] < crit)[:, None]
    draw = jnp.where(accept, x, x0)
    return draw, cur_u, jnp.mean(accept.astype(jnp.float32))


if __name__ == "__main__":
    B, D = 256, 128              # 2 blocks of 128 rows -> parallel 2-step grid
    NUM_STEPS = 5                # module's numSteps
    STEP_SIZE = 0.05             # module's stepSize

    key = jax.random.PRNGKey(0)
    k_x, k_w, k_m, k_z = jax.random.split(key, 4)

    # Symmetric positive-definite precision matrix for the Gaussian energy.
    W = jax.random.normal(k_w, (D, D), dtype=jnp.float32) * 0.1
    A = jnp.eye(D, dtype=jnp.float32) + (W @ W.T) / jnp.float32(D)

    previous_sample = jax.random.normal(k_x, (B, D), dtype=jnp.float32)
    mntm = jax.random.normal(k_m, (B, D), dtype=jnp.float32)      # torch.randn_like
    z = jax.random.uniform(k_z, (1,), dtype=jnp.float32)          # torch.rand(1)

    # Default (bf16-matmul) run -- the production configuration on v6e/v7x.
    draw_final, u_final, acceptance = leapfrog_regular(
        previous_sample, A, mntm, z,
        num_steps=NUM_STEPS, step_size=STEP_SIZE)
    jax.block_until_ready((draw_final, u_final, acceptance))

    assert draw_final.shape == (B, D)
    assert u_final.shape == (B,)
    assert bool(jnp.all(jnp.isfinite(draw_final)))
    assert bool(jnp.all(jnp.isfinite(u_final)))
    assert 0.0 <= float(acceptance) <= 1.0

    # f32-matmul run checked against a pure-jnp reference (U_final is
    # z-independent, so this comparison is not accept/reject-boundary sensitive).
    draw32, u32, acc32 = leapfrog_regular(
        previous_sample, A, mntm, z,
        num_steps=NUM_STEPS, step_size=STEP_SIZE, matmul_dtype=jnp.float32)
    _, u_ref, _ = _leapfrog_reference(
        previous_sample, A, mntm, z, num_steps=NUM_STEPS, step_size=STEP_SIZE)
    jax.block_until_ready((draw32, u32, acc32))
    assert bool(jnp.allclose(u32, u_ref, rtol=1e-4, atol=1e-3))
    assert 0.0 <= float(acc32) <= 1.0

    # Non-multiple-of-128 batch exercises the padded-batch path (2 blocks kept).
    B_odd = 100
    x_odd = previous_sample[:B_odd]
    m_odd = mntm[:B_odd]
    draw_o, u_o, acc_o = leapfrog_regular(
        x_odd, A, m_odd, z,
        num_steps=NUM_STEPS, step_size=STEP_SIZE, matmul_dtype=jnp.float32)
    jax.block_until_ready((draw_o, u_o, acc_o))
    assert draw_o.shape == (B_odd, D) and u_o.shape == (B_odd,)
    assert bool(jnp.all(jnp.isfinite(draw_o)))
    assert bool(jnp.all(jnp.isfinite(u_o)))
    assert 0.0 <= float(acc_o) <= 1.0

    print("KERNEL_OK")
</pallas_src>

<mosaic_0001>
module attributes {stable_mosaic.version = 11 : i64} {
  func.func @_leapfrog_kernel(%arg0: i32, %arg1: memref<1xf32, #tpu.memory_space<smem>>, %arg2: memref<128x128xf32, #tpu.memory_space<vmem>>, %arg3: memref<128x128xf32, #tpu.memory_space<vmem>>, %arg4: memref<128x128xbf16, #tpu.memory_space<vmem>>, %arg5: memref<128x128xf32, #tpu.memory_space<vmem>>, %arg6: memref<128x1xf32, #tpu.memory_space<vmem>>, %arg7: memref<128x1xf32, #tpu.memory_space<vmem>>) attributes {dimension_semantics = [#tpu.dimension_semantics<parallel>], iteration_bounds = array<i64: 2>, scalar_prefetch = 1 : i64, scratch_operands = 0 : i64, tpu.core_type = #tpu.core_type<tc>, window_params = [{transform_indices = @transform_0, window_bounds = array<i64: 128, 128>}, {transform_indices = @transform_1, window_bounds = array<i64: 128, 128>}, {pipeline_mode = #tpu.pipeline_mode<synchronous>, transform_indices = @transform_2, window_bounds = array<i64: 128, 128>}, {transform_indices = @transform_3, window_bounds = array<i64: 128, 128>}, {transform_indices = @transform_4, window_bounds = array<i64: 128, 1>}, {transform_indices = @transform_5, window_bounds = array<i64: 128, 1>}]} {
    %c0 = arith.constant 0 : index
    %c0_0 = arith.constant 0 : index
    %0 = vector.load %arg2[%c0, %c0_0] : memref<128x128xf32, #tpu.memory_space<vmem>>, vector<64x128xf32>
    %c64 = arith.constant 64 : index
    %c0_1 = arith.constant 0 : index
    %1 = vector.load %arg2[%c64, %c0_1] : memref<128x128xf32, #tpu.memory_space<vmem>>, vector<64x128xf32>
    %c0_2 = arith.constant 0 : index
    %c0_3 = arith.constant 0 : index
    %2 = vector.load %arg3[%c0_2, %c0_3] : memref<128x128xf32, #tpu.memory_space<vmem>>, vector<64x128xf32>
    %c64_4 = arith.constant 64 : index
    %c0_5 = arith.constant 0 : index
    %3 = vector.load %arg3[%c64_4, %c0_5] : memref<128x128xf32, #tpu.memory_space<vmem>>, vector<64x128xf32>
    %4 = arith.truncf %0 : vector<64x128xf32> to vector<64x128xbf16>
    %c0_6 = arith.constant 0 : index
    %c0_7 = arith.constant 0 : index
    %5 = vector.load %arg4[%c0_6, %c0_7] : memref<128x128xbf16, #tpu.memory_space<vmem>>, vector<128x128xbf16>
    %cst = arith.constant dense<0.000000e+00> : vector<64x128xf32>
    %6 = tpu.matmul %4, %5, %cst {dimension_numbers = #tpu.dot_dimension_numbers<[1], [0], [0], [1], [0, 0, 1, 1], [], []>} : vector<64x128xbf16>, vector<128x128xbf16>, vector<64x128xf32> -> vector<64x128xf32>
    %7 = arith.truncf %1 : vector<64x128xf32> to vector<64x128xbf16>
    %c0_8 = arith.constant 0 : index
    %c0_9 = arith.constant 0 : index
    %8 = vector.load %arg4[%c0_8, %c0_9] : memref<128x128xbf16, #tpu.memory_space<vmem>>, vector<128x128xbf16>
    %cst_10 = arith.constant dense<0.000000e+00> : vector<64x128xf32>
    %9 = tpu.matmul %7, %8, %cst_10 {dimension_numbers = #tpu.dot_dimension_numbers<[1], [0], [0], [1], [0, 0, 1, 1], [], []>} : vector<64x128xbf16>, vector<128x128xbf16>, vector<64x128xf32> -> vector<64x128xf32>
    %10 = arith.mulf %0, %6 : vector<64x128xf32>
    %cst_11 = arith.constant dense<0.000000e+00> : vector<64xf32>
    %11 = vector.multi_reduction <add>, %10, %cst_11 [1] : vector<64x128xf32> to vector<64xf32>
    %12 = vector.shape_cast %11 : vector<64xf32> to vector<64x1xf32>
    %cst_12 = arith.constant 5.000000e-01 : f32
    %13 = vector.broadcast %cst_12 : f32 to vector<64x1xf32>
    %14 = arith.mulf %13, %12 : vector<64x1xf32>
    %15 = arith.mulf %1, %9 : vector<64x128xf32>
    %cst_13 = arith.constant dense<0.000000e+00> : vector<64xf32>
    %16 = vector.multi_reduction <add>, %15, %cst_13 [1] : vector<64x128xf32> to vector<64xf32>
    %17 = vector.shape_cast %16 : vector<64xf32> to vector<64x1xf32>
    %cst_14 = arith.constant 5.000000e-01 : f32
    %18 = vector.broadcast %cst_14 : f32 to vector<64x1xf32>
    %19 = arith.mulf %18, %17 : vector<64x1xf32>
    %20 = arith.mulf %2, %2 : vector<64x128xf32>
    %cst_15 = arith.constant dense<0.000000e+00> : vector<64xf32>
    %21 = vector.multi_reduction <add>, %20, %cst_15 [1] : vector<64x128xf32> to vector<64xf32>
    %22 = vector.shape_cast %21 : vector<64xf32> to vector<64x1xf32>
    %cst_16 = arith.constant 5.000000e-01 : f32
    %23 = vector.broadcast %cst_16 : f32 to vector<64x1xf32>
    %24 = arith.mulf %23, %22 : vector<64x1xf32>
    %25 = arith.mulf %3, %3 : vector<64x128xf32>
    %cst_17 = arith.constant dense<0.000000e+00> : vector<64xf32>
    %26 = vector.multi_reduction <add>, %25, %cst_17 [1] : vector<64x128xf32> to vector<64xf32>
    %27 = vector.shape_cast %26 : vector<64xf32> to vector<64x1xf32>
    %cst_18 = arith.constant 5.000000e-01 : f32
    %28 = vector.broadcast %cst_18 : f32 to vector<64x1xf32>
    %29 = arith.mulf %28, %27 : vector<64x1xf32>
    %cst_19 = arith.constant 2.500000e-02 : f32
    %30 = vector.broadcast %cst_19 : f32 to vector<64x128xf32>
    %31 = arith.mulf %30, %6 : vector<64x128xf32>
    %32 = arith.subf %2, %31 : vector<64x128xf32>
    %cst_20 = arith.constant 2.500000e-02 : f32
    %33 = vector.broadcast %cst_20 : f32 to vector<64x128xf32>
    %34 = arith.mulf %33, %9 : vector<64x128xf32>
    %35 = arith.subf %3, %34 : vector<64x128xf32>
    %cst_21 = arith.constant 5.000000e-02 : f32
    %36 = vector.broadcast %cst_21 : f32 to vector<64x128xf32>
    %37 = arith.mulf %36, %32 : vector<64x128xf32>
    %38 = arith.addf %0, %37 : vector<64x128xf32>
    %cst_22 = arith.constant 5.000000e-02 : f32
    %39 = vector.broadcast %cst_22 : f32 to vector<64x128xf32>
    %40 = arith.mulf %39, %35 : vector<64x128xf32>
    %41 = arith.addf %1, %40 : vector<64x128xf32>
    %42 = arith.truncf %38 : vector<64x128xf32> to vector<64x128xbf16>
    %c0_23 = arith.constant 0 : index
    %c0_24 = arith.constant 0 : index
    %43 = vector.load %arg4[%c0_23, %c0_24] : memref<128x128xbf16, #tpu.memory_space<vmem>>, vector<128x128xbf16>
    %cst_25 = arith.constant dense<0.000000e+00> : vector<64x128xf32>
    %44 = tpu.matmul %42, %43, %cst_25 {dimension_numbers = #tpu.dot_dimension_numbers<[1], [0], [0], [1], [0, 0, 1, 1], [], []>} : vector<64x128xbf16>, vector<128x128xbf16>, vector<64x128xf32> -> vector<64x128xf32>
    %45 = arith.truncf %41 : vector<64x128xf32> to vector<64x128xbf16>
    %c0_26 = arith.constant 0 : index
    %c0_27 = arith.constant 0 : index
    %46 = vector.load %arg4[%c0_26, %c0_27] : memref<128x128xbf16, #tpu.memory_space<vmem>>, vector<128x128xbf16>
    %cst_28 = arith.constant dense<0.000000e+00> : vector<64x128xf32>
    %47 = tpu.matmul %45, %46, %cst_28 {dimension_numbers = #tpu.dot_dimension_numbers<[1], [0], [0], [1], [0, 0, 1, 1], [], []>} : vector<64x128xbf16>, vector<128x128xbf16>, vector<64x128xf32> -> vector<64x128xf32>
    %cst_29 = arith.constant 5.000000e-02 : f32
    %c0_i32 = arith.constant 0 : i32
    %48 = vector.broadcast %cst_29 : f32 to vector<64x128xf32>
    %49 = arith.mulf %48, %44 : vector<64x128xf32>
    %50 = arith.subf %32, %49 : vector<64x128xf32>
    %51 = vector.broadcast %cst_29 : f32 to vector<64x128xf32>
    %52 = arith.mulf %51, %47 : vector<64x128xf32>
    %53 = arith.subf %35, %52 : vector<64x128xf32>
    %54 = vector.broadcast %cst_29 : f32 to vector<64x128xf32>
    %55 = arith.mulf %54, %50 : vector<64x128xf32>
    %56 = arith.addf %38, %55 : vector<64x128xf32>
    %57 = vector.broadcast %cst_29 : f32 to vector<64x128xf32>
    %58 = arith.mulf %57, %53 : vector<64x128xf32>
    %59 = arith.addf %41, %58 : vector<64x128xf32>
    %60 = arith.truncf %56 : vector<64x128xf32> to vector<64x128xbf16>
    %c0_30 = arith.constant 0 : index
    %c0_31 = arith.constant 0 : index
    %61 = vector.load %arg4[%c0_30, %c0_31] : memref<128x128xbf16, #tpu.memory_space<vmem>>, vector<128x128xbf16>
    %cst_32 = arith.constant dense<0.000000e+00> : vector<64x128xf32>
    %62 = tpu.matmul %60, %61, %cst_32 {dimension_numbers = #tpu.dot_dimension_numbers<[1], [0], [0], [1], [0, 0, 1, 1], [], []>} : vector<64x128xbf16>, vector<128x128xbf16>, vector<64x128xf32> -> vector<64x128xf32>
    %63 = arith.truncf %59 : vector<64x128xf32> to vector<64x128xbf16>
    %c0_33 = arith.constant 0 : index
    %c0_34 = arith.constant 0 : index
    %64 = vector.load %arg4[%c0_33, %c0_34] : memref<128x128xbf16, #tpu.memory_space<vmem>>, vector<128x128xbf16>
    %cst_35 = arith.constant dense<0.000000e+00> : vector<64x128xf32>
    %65 = tpu.matmul %63, %64, %cst_35 {dimension_numbers = #tpu.dot_dimension_numbers<[1], [0], [0], [1], [0, 0, 1, 1], [], []>} : vector<64x128xbf16>, vector<128x128xbf16>, vector<64x128xf32> -> vector<64x128xf32>
    %c1_i32 = arith.constant 1 : i32
    %66 = vector.broadcast %cst_29 : f32 to vector<64x128xf32>
    %67 = arith.mulf %66, %62 : vector<64x128xf32>
    %68 = arith.subf %50, %67 : vector<64x128xf32>
    %69 = vector.broadcast %cst_29 : f32 to vector<64x128xf32>
    %70 = arith.mulf %69, %65 : vector<64x128xf32>
    %71 = arith.subf %53, %70 : vector<64x128xf32>
    %72 = vector.broadcast %cst_29 : f32 to vector<64x128xf32>
    %73 = arith.mulf %72, %68 : vector<64x128xf32>
    %74 = arith.addf %56, %73 : vector<64x128xf32>
    %75 = vector.broadcast %cst_29 : f32 to vector<64x128xf32>
    %76 = arith.mulf %75, %71 : vector<64x128xf32>
    %77 = arith.addf %59, %76 : vector<64x128xf32>
    %78 = arith.truncf %74 : vector<64x128xf32> to vector<64x128xbf16>
    %c0_36 = arith.constant 0 : index
    %c0_37 = arith.constant 0 : index
    %79 = vector.load %arg4[%c0_36, %c0_37] : memref<128x128xbf16, #tpu.memory_space<vmem>>, vector<128x128xbf16>
    %cst_38 = arith.constant dense<0.000000e+00> : vector<64x128xf32>
    %80 = tpu.matmul %78, %79, %cst_38 {dimension_numbers = #tpu.dot_dimension_numbers<[1], [0], [0], [1], [0, 0, 1, 1], [], []>} : vector<64x128xbf16>, vector<128x128xbf16>, vector<64x128xf32> -> vector<64x128xf32>
    %81 = arith.truncf %77 : vector<64x128xf32> to vector<64x128xbf16>
    %c0_39 = arith.constant 0 : index
    %c0_40 = arith.constant 0 : index
    %82 = vector.load %arg4[%c0_39, %c0_40] : memref<128x128xbf16, #tpu.memory_space<vmem>>, vector<128x128xbf16>
    %cst_41 = arith.constant dense<0.000000e+00> : vector<64x128xf32>
    %83 = tpu.matmul %81, %82, %cst_41 {dimension_numbers = #tpu.dot_dimension_numbers<[1], [0], [0], [1], [0, 0, 1, 1], [], []>} : vector<64x128xbf16>, vector<128x128xbf16>, vector<64x128xf32> -> vector<64x128xf32>
    %c2_i32 = arith.constant 2 : i32
    %84 = vector.broadcast %cst_29 : f32 to vector<64x128xf32>
    %85 = arith.mulf %84, %80 : vector<64x128xf32>
    %86 = arith.subf %68, %85 : vector<64x128xf32>
    %87 = vector.broadcast %cst_29 : f32 to vector<64x128xf32>
    %88 = arith.mulf %87, %83 : vector<64x128xf32>
    %89 = arith.subf %71, %88 : vector<64x128xf32>
    %90 = vector.broadcast %cst_29 : f32 to vector<64x128xf32>
    %91 = arith.mulf %90, %86 : vector<64x128xf32>
    %92 = arith.addf %74, %91 : vector<64x128xf32>
    %93 = vector.broadcast %cst_29 : f32 to vector<64x128xf32>
    %94 = arith.mulf %93, %89 : vector<64x128xf32>
    %95 = arith.addf %77, %94 : vector<64x128xf32>
    %96 = arith.truncf %92 : vector<64x128xf32> to vector<64x128xbf16>
    %c0_42 = arith.constant 0 : index
    %c0_43 = arith.constant 0 : index
    %97 = vector.load %arg4[%c0_42, %c0_43] : memref<128x128xbf16, #tpu.memory_space<vmem>>, vector<128x128xbf16>
    %cst_44 = arith.constant dense<0.000000e+00> : vector<64x128xf32>
    %98 = tpu.matmul %96, %97, %cst_44 {dimension_numbers = #tpu.dot_dimension_numbers<[1], [0], [0], [1], [0, 0, 1, 1], [], []>} : vector<64x128xbf16>, vector<128x128xbf16>, vector<64x128xf32> -> vector<64x128xf32>
    %99 = arith.truncf %95 : vector<64x128xf32> to vector<64x128xbf16>
    %c0_45 = arith.constant 0 : index
    %c0_46 = arith.constant 0 : index
    %100 = vector.load %arg4[%c0_45, %c0_46] : memref<128x128xbf16, #tpu.memory_space<vmem>>, vector<128x128xbf16>
    %cst_47 = arith.constant dense<0.000000e+00> : vector<64x128xf32>
    %101 = tpu.matmul %99, %100, %cst_47 {dimension_numbers = #tpu.dot_dimension_numbers<[1], [0], [0], [1], [0, 0, 1, 1], [], []>} : vector<64x128xbf16>, vector<128x128xbf16>, vector<64x128xf32> -> vector<64x128xf32>
    %c3_i32 = arith.constant 3 : i32
    %102 = vector.broadcast %cst_29 : f32 to vector<64x128xf32>
    %103 = arith.mulf %102, %98 : vector<64x128xf32>
    %104 = arith.subf %86, %103 : vector<64x128xf32>
    %105 = vector.broadcast %cst_29 : f32 to vector<64x128xf32>
    %106 = arith.mulf %105, %101 : vector<64x128xf32>
    %107 = arith.subf %89, %106 : vector<64x128xf32>
    %108 = vector.broadcast %cst_29 : f32 to vector<64x128xf32>
    %109 = arith.mulf %108, %104 : vector<64x128xf32>
    %110 = arith.addf %92, %109 : vector<64x128xf32>
    %111 = vector.broadcast %cst_29 : f32 to vector<64x128xf32>
    %112 = arith.mulf %111, %107 : vector<64x128xf32>
    %113 = arith.addf %95, %112 : vector<64x128xf32>
    %114 = arith.truncf %110 : vector<64x128xf32> to vector<64x128xbf16>
    %c0_48 = arith.constant 0 : index
    %c0_49 = arith.constant 0 : index
    %115 = vector.load %arg4[%c0_48, %c0_49] : memref<128x128xbf16, #tpu.memory_space<vmem>>, vector<128x128xbf16>
    %cst_50 = arith.constant dense<0.000000e+00> : vector<64x128xf32>
    %116 = tpu.matmul %114, %115, %cst_50 {dimension_numbers = #tpu.dot_dimension_numbers<[1], [0], [0], [1], [0, 0, 1, 1], [], []>} : vector<64x128xbf16>, vector<128x128xbf16>, vector<64x128xf32> -> vector<64x128xf32>
    %117 = arith.truncf %113 : vector<64x128xf32> to vector<64x128xbf16>
    %c0_51 = arith.constant 0 : index
    %c0_52 = arith.constant 0 : index
    %118 = vector.load %arg4[%c0_51, %c0_52] : memref<128x128xbf16, #tpu.memory_space<vmem>>, vector<128x128xbf16>
    %cst_53 = arith.constant dense<0.000000e+00> : vector<64x128xf32>
    %119 = tpu.matmul %117, %118, %cst_53 {dimension_numbers = #tpu.dot_dimension_numbers<[1], [0], [0], [1], [0, 0, 1, 1], [], []>} : vector<64x128xbf16>, vector<128x128xbf16>, vector<64x128xf32> -> vector<64x128xf32>
    %cst_54 = arith.constant 2.500000e-02 : f32
    %120 = vector.broadcast %cst_54 : f32 to vector<64x128xf32>
    %121 = arith.mulf %120, %116 : vector<64x128xf32>
    %122 = arith.subf %104, %121 : vector<64x128xf32>
    %cst_55 = arith.constant 2.500000e-02 : f32
    %123 = vector.broadcast %cst_55 : f32 to vector<64x128xf32>
    %124 = arith.mulf %123, %119 : vector<64x128xf32>
    %125 = arith.subf %107, %124 : vector<64x128xf32>
    %c0_56 = arith.constant 0 : index
    %126 = memref.load %arg1[%c0_56] : memref<1xf32, #tpu.memory_space<smem>>
    %127 = arith.mulf %110, %116 : vector<64x128xf32>
    %cst_57 = arith.constant dense<0.000000e+00> : vector<64xf32>
    %128 = vector.multi_reduction <add>, %127, %cst_57 [1] : vector<64x128xf32> to vector<64xf32>
    %129 = vector.shape_cast %128 : vector<64xf32> to vector<64x1xf32>
    %cst_58 = arith.constant 5.000000e-01 : f32
    %130 = vector.broadcast %cst_58 : f32 to vector<64x1xf32>
    %131 = arith.mulf %130, %129 : vector<64x1xf32>
    %132 = arith.mulf %122, %122 : vector<64x128xf32>
    %cst_59 = arith.constant dense<0.000000e+00> : vector<64xf32>
    %133 = vector.multi_reduction <add>, %132, %cst_59 [1] : vector<64x128xf32> to vector<64xf32>
    %134 = vector.shape_cast %133 : vector<64xf32> to vector<64x1xf32>
    %cst_60 = arith.constant 5.000000e-01 : f32
    %135 = vector.broadcast %cst_60 : f32 to vector<64x1xf32>
    %136 = arith.mulf %135, %134 : vector<64x1xf32>
    %137 = arith.addf %14, %24 : vector<64x1xf32>
    %138 = arith.subf %137, %131 : vector<64x1xf32>
    %139 = arith.subf %138, %136 : vector<64x1xf32>
    %140 = math.exp %139 : vector<64x1xf32>
    %cst_61 = arith.constant 1.000000e+00 : f32
    %141 = vector.broadcast %cst_61 : f32 to vector<64x1xf32>
    %142 = arith.minimumf %141, %140 : vector<64x1xf32>
    %143 = vector.broadcast %126 : f32 to vector<64x1xf32>
    %144 = arith.cmpf olt, %143, %142 : vector<64x1xf32>
    %c0_62 = arith.constant 0 : index
    %c0_63 = arith.constant 0 : index
    %145 = vector.load %arg2[%c0_62, %c0_63] : memref<128x128xf32, #tpu.memory_space<vmem>>, vector<64x128xf32>
    %146 = vector.shape_cast %144 : vector<64x1xi1> to vector<64x1xi1>
    %147 = vector.broadcast %146 : vector<64x1xi1> to vector<64x128xi1>
    %148 = arith.select %147, %110, %145 : vector<64x128xi1>, vector<64x128xf32>
    %c0_64 = arith.constant 0 : index
    %c0_65 = arith.constant 0 : index
    %149 = vector.load %arg5[%c0_64, %c0_65] : memref<128x128xf32, #tpu.memory_space<vmem>>, vector<64x128xf32>
    tpu.vector_store %arg5[%c0_64, %c0_65], %148 {strides = array<i32>} : memref<128x128xf32, #tpu.memory_space<vmem>>, vector<64x128xf32>,
    %c0_66 = arith.constant 0 : index
    %c0_67 = arith.constant 0 : index
    %150 = vector.load %arg6[%c0_66, %c0_67] : memref<128x1xf32, #tpu.memory_space<vmem>>, vector<64x1xf32>
    tpu.vector_store %arg6[%c0_66, %c0_67], %131 {strides = array<i32>} : memref<128x1xf32, #tpu.memory_space<vmem>>, vector<64x1xf32>,
    %151 = arith.extui %144 : vector<64x1xi1> to vector<64x1xi32>
    %152 = arith.sitofp %151 : vector<64x1xi32> to vector<64x1xf32>
    %c0_68 = arith.constant 0 : index
    %c0_69 = arith.constant 0 : index
    %153 = vector.load %arg7[%c0_68, %c0_69] : memref<128x1xf32, #tpu.memory_space<vmem>>, vector<64x1xf32>
    tpu.vector_store %arg7[%c0_68, %c0_69], %152 {strides = array<i32>} : memref<128x1xf32, #tpu.memory_space<vmem>>, vector<64x1xf32>,
    %154 = arith.mulf %113, %119 : vector<64x128xf32>
    %cst_70 = arith.constant dense<0.000000e+00> : vector<64xf32>
    %155 = vector.multi_reduction <add>, %154, %cst_70 [1] : vector<64x128xf32> to vector<64xf32>
    %156 = vector.shape_cast %155 : vector<64xf32> to vector<64x1xf32>
    %cst_71 = arith.constant 5.000000e-01 : f32
    %157 = vector.broadcast %cst_71 : f32 to vector<64x1xf32>
    %158 = arith.mulf %157, %156 : vector<64x1xf32>
    %159 = arith.mulf %125, %125 : vector<64x128xf32>
    %cst_72 = arith.constant dense<0.000000e+00> : vector<64xf32>
    %160 = vector.multi_reduction <add>, %159, %cst_72 [1] : vector<64x128xf32> to vector<64xf32>
    %161 = vector.shape_cast %160 : vector<64xf32> to vector<64x1xf32>
    %cst_73 = arith.constant 5.000000e-01 : f32
    %162 = vector.broadcast %cst_73 : f32 to vector<64x1xf32>
    %163 = arith.mulf %162, %161 : vector<64x1xf32>
    %164 = arith.addf %19, %29 : vector<64x1xf32>
    %165 = arith.subf %164, %158 : vector<64x1xf32>
    %166 = arith.subf %165, %163 : vector<64x1xf32>
    %167 = math.exp %166 : vector<64x1xf32>
    %cst_74 = arith.constant 1.000000e+00 : f32
    %168 = vector.broadcast %cst_74 : f32 to vector<64x1xf32>
    %169 = arith.minimumf %168, %167 : vector<64x1xf32>
    %170 = vector.broadcast %126 : f32 to vector<64x1xf32>
    %171 = arith.cmpf olt, %170, %169 : vector<64x1xf32>
    %c64_75 = arith.constant 64 : index
    %c0_76 = arith.constant 0 : index
    %172 = vector.load %arg2[%c64_75, %c0_76] : memref<128x128xf32, #tpu.memory_space<vmem>>, vector<64x128xf32>
    %173 = vector.shape_cast %171 : vector<64x1xi1> to vector<64x1xi1>
    %174 = vector.broadcast %173 : vector<64x1xi1> to vector<64x128xi1>
    %175 = arith.select %174, %113, %172 : vector<64x128xi1>, vector<64x128xf32>
    %c64_77 = arith.constant 64 : index
    %c0_78 = arith.constant 0 : index
    %176 = vector.load %arg5[%c64_77, %c0_78] : memref<128x128xf32, #tpu.memory_space<vmem>>, vector<64x128xf32>
    tpu.vector_store %arg5[%c64_77, %c0_78], %175 {strides = array<i32>} : memref<128x128xf32, #tpu.memory_space<vmem>>, vector<64x128xf32>,
    %c64_79 = arith.constant 64 : index
    %c0_80 = arith.constant 0 : index
    %177 = vector.load %arg6[%c64_79, %c0_80] : memref<128x1xf32, #tpu.memory_space<vmem>>, vector<64x1xf32>
    tpu.vector_store %arg6[%c64_79, %c0_80], %158 {strides = array<i32>} : memref<128x1xf32, #tpu.memory_space<vmem>>, vector<64x1xf32>,
    %178 = arith.extui %171 : vector<64x1xi1> to vector<64x1xi32>
    %179 = arith.sitofp %178 : vector<64x1xi32> to vector<64x1xf32>
    %c64_81 = arith.constant 64 : index
    %c0_82 = arith.constant 0 : index
    %180 = vector.load %arg7[%c64_81, %c0_82] : memref<128x1xf32, #tpu.memory_space<vmem>>, vector<64x1xf32>
    tpu.vector_store %arg7[%c64_81, %c0_82], %179 {strides = array<i32>} : memref<128x1xf32, #tpu.memory_space<vmem>>, vector<64x1xf32>,
    return
  }
  func.func @transform_0(%arg0: i32, %arg1: memref<1xf32, #tpu.memory_space<smem>>) -> (i32, i32) {
    %c0_i32 = arith.constant 0 : i32
    %c0_i32_0 = arith.constant 0 : i32
    return %arg0, %c0_i32 : i32, i32
  }
  func.func @transform_1(%arg0: i32, %arg1: memref<1xf32, #tpu.memory_space<smem>>) -> (i32, i32) {
    %c0_i32 = arith.constant 0 : i32
    %c0_i32_0 = arith.constant 0 : i32
    return %arg0, %c0_i32 : i32, i32
  }
  func.func @transform_2(%arg0: i32, %arg1: memref<1xf32, #tpu.memory_space<smem>>) -> (i32, i32) {
    %c0_i32 = arith.constant 0 : i32
    %c0_i32_0 = arith.constant 0 : i32
    %c0_i32_1 = arith.constant 0 : i32
    return %c0_i32, %c0_i32_0 : i32, i32
  }
  func.func @transform_3(%arg0: i32, %arg1: memref<1xf32, #tpu.memory_space<smem>>) -> (i32, i32) {
    %c0_i32 = arith.constant 0 : i32
    %c0_i32_0 = arith.constant 0 : i32
    return %arg0, %c0_i32 : i32, i32
  }
  func.func @transform_4(%arg0: i32, %arg1: memref<1xf32, #tpu.memory_space<smem>>) -> (i32, i32) {
    %c0_i32 = arith.constant 0 : i32
    %c0_i32_0 = arith.constant 0 : i32
    return %arg0, %c0_i32 : i32, i32
  }
  func.func @transform_5(%arg0: i32, %arg1: memref<1xf32, #tpu.memory_space<smem>>) -> (i32, i32) {
    %c0_i32 = arith.constant 0 : i32
    %c0_i32_0 = arith.constant 0 : i32
    return %arg0, %c0_i32 : i32, i32
  }
}

</mosaic_0001>

<bundles_post_ra>
// kernel: tpu_custom_call.1
= control target key start
LH: loop header
LB: loop body
LE: loop exit
PB: predicated region body
PF: predicated region fallthrough
CT: control target
= control target key end

     0   :  { %s4765_s0 = inlined_call_operand.<no memory space> [shape: f32[1], index: 0, kind: input, shape index: {}]   ;;  %s4766_s1 = inlined_call_operand.hbm [shape: f32[256,128], index: 1, kind: input, shape index: {}]   ;;  %s4767_s2 = inlined_call_operand.hbm [shape: f32[256,128], index: 2, kind: input, shape index: {}]   ;;  %s4768_s3 = inlined_call_operand.hbm [shape: bf16[128,128], index: 3, kind: input, shape index: {}]   ;;  %s4769_s4 = inlined_call_operand.hbm [shape: f32[256,128], index: 4, kind: output, shape index: {0}]   ;;  %s4770_s5 = inlined_call_operand.vmem [shape: f32[256,1], index: 5, kind: output, shape index: {1}]   ;;  %s4771_s6 = inlined_call_operand.vmem [shape: f32[256,1], index: 6, kind: output, shape index: {2}]  }
   0x1   :  { %4783 = sst [smem:[#allocation41_spill]] %s4766_s1 }
   0x2   :  { %4784 = sst [smem:[#allocation42_spill]] %s4768_s3 }
   0x3   :  { %12 = sst [smem:[#allocation3]] %s4765_s0 }
   0x4   :  { %13 = vsyncpa [#allocation5], 0 }
   0x5   :  { %15 = vsyncpa [#allocation5 + $0x1], 0 }
   0x6   :  { %16 = vsyncpa [#allocation8], 0 }
   0x7   :  { %18 = vsyncpa [#allocation8 + $0x1], 0 }
   0x8   :  { %19 = vsyncpa [#allocation6], 0 }
   0x9   :  { %21 = vsyncpa [#allocation6 + $0x1], 0  ;;  %s3105_s23 = smov 0   ;;  %s3107_s24 = smov 0  }
   0xa   :  { %s3109_s25 = smov 0   ;;  %s3111_s26 = smov 0  }
   0xb LB: > { %s3126_s0 = sadd.s32 4294967295, %s3054_s26   ;;  %s2284_s27 = sadd.s32 4294967294, %s3054_s26   ;;  %s3054_s26 = sphi %s3111_s26, %s4857_s26   ;;  %s3050_s25 = sphi %s3109_s25, %s4856_s25   ;;  %s3046_s24 = sphi %s3107_s24, %s4855_s24   ;;  %s3042_s23 = sphi %s3105_s23, %s4854_s23  }
   0xc   : > { %p47_p0 = scmp.ne.s32.totalorder %s3046_s24, %s3042_s23  ;;  %p4772_p1 = scmp.eq.s32.totalorder %s3126_s0, 0 }
   0xd   : > { %p124_p3 = scmp.eq.s32.totalorder %s2284_s27, 1  ;;  %p2285_p5 = scmp.ge.s32.totalorder %s3054_s26, 1 }
   0xe   : > { %p3135_p4 = por %p4772_p1, %p47_p0  ;;  %p183_p7 = scmp.lt.s32.totalorder %s3054_s26, 3 }
   0xf   : > { %p3140_p6 = por %p124_p3, %p47_p0  ;;  %s3056_s7 = smov [#allocation9]  }
  0x10   : > { %s4785_s28 = scalar_select %p3135_p4, 1, 0 }
  0x11   : > { %s4786_s29 = scalar_select %p3140_p6, 1, 0 }
  0x12   : > { %p3145_p8 = pnand %p2285_p5, %p183_p7  ;;  %s195_s8 = sshll.u32 %s3056_s7, 4  ;;  %s3149_s8 = int_to_ptr.vmem [resolvable:$true] %s195_s8 }
  0x13   : > { %s3161_s10 = sadd.s32 1, %s3054_s26   ;;  %s34_s11 = sadd.s32 1, %s3050_s25 }
  0x14   : > { %s4787_s30 = scalar_select %p3145_p8, 1, 0 }
  0x15   : > { %p2777_p9 = pneg %p3145_p8  ;;  %s31_s12 = ssub.s32 %s3054_s26, %s3161_s10 }
  0x16   : > { %s4789_s3 = sld [smem:[#allocation42_spill]] }
  0x17   : > { %p3156_p11 = pnand %p2777_p9, %p4772_p1 }
  0x19   : > { %p2894_p13 = pneg %p3156_p11 }
  0x1c   : > { %s2892_s15 = scalar_lea.hbm %s4789_s3, 1024 }
  0x1d   : > { %p2893_p12 = scmp.ne.s32.totalorder %s4789_s3, %s2892_s15  ;;  %p2899_p5 = scmp.lt.u32.totalorder %s2892_s15, %s4789_s3 }
  0x1f   : > { %p2895_p0 = pnand %p2894_p13, %p2893_p12 }
  0x21   : > { %p2896_p3 = pneg %p2895_p0 }
  0x23   : > { %p2901_p7 = pnand %p2899_p5, %p2896_p3 }
  0x25   : > { %2904 = shalt.err (!%p2901_p7)
}
  0x26   : > { %s2905_s20 = scalar_lea.vmem %s3149_s8, 1024  ;;  %p2913_p2 = scmp.lt.s32.totalorder %s3149_s8, %s3149_s8 }
  0x27   : > { %p2906_p9 = scmp.ne.s32.totalorder %s3149_s8, %s2905_s20  ;;  %p2914_p6 = scmp.lt.s32.totalorder %s2905_s20, %s2905_s20 }
  0x29   : > { %p2908_p10 = pnand %p2906_p9, %p2894_p13  ;;  %p2915_p4 = por %p2914_p6, %p2913_p2 }
  0x2b   : > { %p2909_p1 = pneg %p2908_p10 }
  0x2d   : > { %p2916_p8 = pnand %p2915_p4, %p2909_p1 }
  0x2f   : > { %2919 = shalt.err (!%p2916_p8)
}
  0x30   : > { %s3057_s21 = smov 64   ;;  %s3058_s22 = smov 4  }
  0x31   : > { %2780 = dma.hbm_to_vmem [thread:$0]  (!%p3156_p11), %s4789_s3, 1024, %s3149_s8, [#allocation8], %s3057_s21, %s3057_s21, %s3058_s22  }
  0x32   : > { %p32_p1 = scmp.eq.s32.totalorder %s31_s12, 0  ;;  %p41_p2 = scmp.ne.s32.totalorder %s3050_s25, %s3046_s24 }
  0x33   : > { %p42_p4 = scmp.eq.s32.totalorder %s3054_s26, 0  ;;  %p2793_p6 = scmp.lt.s32.totalorder %s3054_s26, 2 }
  0x34   : > { %s3192_s13 = scalar_select %p32_p1, %s3050_s25, %s34_s11  }
  0x35   : > { %p43_p8 = por %p42_p4, %p41_p2  ;;  %p4790_p10 = scmp.eq.s32.totalorder %s3126_s0, 1 }
  0x36   : > { %s209_s15 = sand.u32 1, %s3050_s25   ;;  %s2332_s16 = sshll.u32 %s3054_s26, 11 }
  0x37   : > { %p3196_p12 = por %p4790_p10, %p41_p2  ;;  %s3202_s17 = sshll.u32 %s209_s15, 7 }
  0x38   : > { %s4792_s1 = sld [smem:[#allocation41_spill]]  ;;  %s213_s11 = scalar_lea.vmem [#allocation4], %s3202_s17 }
  0x39   : > { %s220_s12 = sshll.u32 %s213_s11, 4  ;;  %p3212_p11 = pnand %p2793_p6, %p43_p8  ;;  %s3216_s12 = int_to_ptr.vmem [resolvable:$true] %s220_s12 }
  0x3a   : > { %s3218_s20 = scalar_lea.sflag [#allocation5], %s209_s15 }
  0x3b   : > { %p2922_p0 = pneg %p3212_p11 }
  0x3e   : > { %s3209_s8 = scalar_lea.hbm %s4792_s1, %s2332_s16  ;;  %s2925_s7 = scalar_lea.hbm %s4792_s1, 4096 }
  0x3f   : > { %s2920_s21 = scalar_lea.hbm %s3209_s8, 2048  ;;  %p2926_p7 = scmp.lt.u32.totalorder %s3209_s8, %s4792_s1 }
  0x40   : > { %p2921_p13 = scmp.ne.s32.totalorder %s3209_s8, %s2920_s21  ;;  %p2927_p9 = scmp.lt.u32.totalorder %s2925_s7, %s2920_s21 }
  0x41   : > { %p2929_p2 = scmp.lt.u32.totalorder %s2920_s21, %s3209_s8 }
  0x42   : > { %p2923_p3 = pnand %p2922_p0, %p2921_p13  ;;  %p2928_p1 = por %p2927_p9, %p2926_p7 }
  0x44   : > { %p2924_p5 = pneg %p2923_p3  ;;  %p2930_p4 = por %p2929_p2, %p2928_p1 }
  0x46   : > { %p2931_p6 = pnand %p2930_p4, %p2924_p5 }
  0x48   : > { %2934 = shalt.err (!%p2931_p6)
}
  0x49   : > { %s2935_s15 = scalar_lea.vmem %s3216_s12, 2048  ;;  %s3059_s11 = smov [#allocation4]  }
  0x4a   : > { %p2936_p8 = scmp.ne.s32.totalorder %s3216_s12, %s2935_s15  ;;  %s2940_s22 = sshll.u32 %s3059_s11, 4  ;;  %s2941_s22 = int_to_ptr.vmem [resolvable:$false] %s2940_s22 }
  0x4b   : > { %s2942_s27 = scalar_lea.vmem %s2941_s22, 4096  ;;  %p2943_p3 = scmp.lt.s32.totalorder %s3216_s12, %s2941_s22 }
  0x4c   : > { %p2938_p10 = pnand %p2936_p8, %p2922_p0  ;;  %p2944_p7 = scmp.lt.s32.totalorder %s2942_s27, %s2935_s15 }
  0x4e   : > { %p2939_p13 = pneg %p2938_p10  ;;  %p2945_p9 = por %p2944_p7, %p2943_p3 }
  0x50   : > { %p2946_p1 = pnand %p2945_p9, %p2939_p13 }
  0x52   : > { %2949 = shalt.err (!%p2946_p1)
}
  0x53   : > { %s3060_s21 = smov 128   ;;  %s3061_s7 = smov 8  }
  0x54   : > { %2784 = dma.hbm_to_vmem [thread:$0]  (!%p3212_p11), %s3209_s8, 2048, %s3216_s12, %s3218_s20, %s3060_s21, %s3060_s21, %s3061_s7  }
  0x55   : > { %s3254_s15 = scalar_lea.hbm %s4767_s2, %s2332_s16  ;;  %s234_s11 = scalar_lea.vmem [#allocation7], %s3202_s17 }
  0x56   : > { %s241_s22 = sshll.u32 %s234_s11, 4  ;;  %s230_s27 = sand.u32 1, %s3054_s26   ;;  %s3258_s22 = int_to_ptr.vmem [resolvable:$true] %s241_s22 }
  0x57   : > { %s3260_s1 = scalar_lea.sflag [#allocation8], %s230_s27  ;;  %s2950_s3 = scalar_lea.hbm %s3254_s15, 2048 }
  0x58   : > { %p2951_p5 = scmp.ne.s32.totalorder %s3254_s15, %s2950_s3  ;;  %s2955_s12 = scalar_lea.hbm %s4767_s2, 4096 }
  0x59   : > { %p2956_p6 = scmp.lt.u32.totalorder %s3254_s15, %s4767_s2  ;;  %p2957_p8 = scmp.lt.u32.totalorder %s2955_s12, %s2950_s3 }
  0x5a   : > { %p2953_p2 = pnand %p2951_p5, %p2922_p0  ;;  %p2959_p13 = scmp.lt.u32.totalorder %s2950_s3, %s3254_s15 }
  0x5b   : > { %p2958_p10 = por %p2957_p8, %p2956_p6 }
  0x5c   : > { %p2954_p4 = pneg %p2953_p2 }
  0x5d   : > { %p2960_p3 = por %p2959_p13, %p2958_p10 }
  0x5f   : > { %p2961_p7 = pnand %p2960_p3, %p2954_p4 }
  0x61   : > { %2964 = shalt.err (!%p2961_p7)
}
  0x62   : > { %s2965_s17 = scalar_lea.vmem %s3258_s22, 2048  ;;  %s3062_s18 = smov [#allocation7]  }
  0x63   : > { %p2966_p9 = scmp.ne.s32.totalorder %s3258_s22, %s2965_s17  ;;  %s2970_s11 = sshll.u32 %s3062_s18, 4  ;;  %s2971_s11 = int_to_ptr.vmem [resolvable:$false] %s2970_s11 }
  0x64   : > { %s2972_s27 = scalar_lea.vmem %s2971_s11, 4096  ;;  %p2973_p2 = scmp.lt.s32.totalorder %s3258_s22, %s2971_s11 }
  0x65   : > { %p2968_p1 = pnand %p2966_p9, %p2922_p0  ;;  %p2974_p6 = scmp.lt.s32.totalorder %s2972_s27, %s2965_s17 }
  0x67   : > { %p2969_p5 = pneg %p2968_p1  ;;  %p2975_p8 = por %p2974_p6, %p2973_p2 }
  0x69   : > { %p2976_p10 = pnand %p2975_p8, %p2969_p5 }
  0x6b   : > { %2979 = shalt.err (!%p2976_p10)
}
  0x6c   : > { %2787 = dma.hbm_to_vmem [thread:$0]  (!%p3212_p11), %s3254_s15, 2048, %s3258_s22, %s3260_s1, %s3060_s21, %s3060_s21, %s3061_s7  }
  0x6d   : > { %p4794_p0 = scmp.ne.s32.totalorder %s4787_s30, 0 }
  0x6f   : > { %253 = sbr.rel (%p4794_p0) target bundleno = 1749 (0x6d5), region = 32 }
  0x76   : > { %s3292_s3 = sand.u32 1, %s3046_s24   ;;  %p4795_p4 = scmp.ne.s32.totalorder %s4785_s28, 0 }
  0x77   : > { %s3295_s8 = sshll.u32 %s3292_s3, 7  ;;  %s256_s19 = scalar_lea.sflag [#allocation5], %s3292_s3 }
  0x78   : > { %s3299_s16 = scalar_lea.vmem [#allocation4], %s3295_s8 }
  0x79   : > { %3025 = dma.done.wait (%p4795_p4), %s256_s19, 2048  }
  0x7a   : > { %3027 = vsyncadd (%p4795_p4), %s256_s19, 4294965248  ;;  %s264_s1 = sand.u32 1, %s3126_s0   ;;  %s3307_s21 = scalar_lea.vmem [#allocation7], %s3295_s8 }
  0x7b   : > { %s265_s30 = scalar_lea.sflag [#allocation8], %s264_s1 }
  0x7c   : > { %3029 = dma.done.wait (%p4795_p4), %s265_s30, 2048  }
  0x7d   : > { %3031 = vsyncadd (%p4795_p4), %s265_s30, 4294965248  ;;  %p4796_p11 = scmp.eq.s32.totalorder %s3126_s0, 0 }
  0x7f   : > { %3033 = dma.done.wait (%p4796_p11), [#allocation8], 1024   ;;  %p4797_p13 = pmov %p4796_p11 }
  0x80   : > { %v3317_v0 = vld [vmem:[#allocation9] sm:$0xff]   ;;  %v3319_v1 = vld [vmem:[#allocation9 + $0x8] sm:$0xff]   ;;  %v3327_v2 = vld [vmem:[#allocation9 + $0x10] sm:$0xff]   ;;  %s2299_s28 = sshll.u32 %s3126_s0, 4  ;;  %vm1888_vm0 = vcmask 7168   ;;  %s1734_s20 = sld [smem:[#allocation3]] }
  0x81   : > { %3035 = vsyncadd (%p4797_p13), [#allocation8], 4294966272  ;;  %2479 = vmatprep.subr.bf16.mxu0 %v3317_v0  ;;  %2503 = vmatprep.subr.bf16.mxu1 %v3317_v0  ;;  %v3331_v3 = vld [vmem:[#allocation9 + $0x18] sm:$0xff]   ;;  %v3336_v4 = vld [vmem:[%s3299_s16] sm:$0xff]  ;;  %p318_p3 = scmp.lt.s32.totalorder %s2299_s28, 31  ;;  %s4552_s11 = scalar_lea.vmem [#allocation10], %s3295_s8 }
  0x82   : > { %2480 = vmatpush3.bf16.msra.mxu0 %v3317_v0  ;;  %2504 = vmatpush3.bf16.msra.mxu1 %v3317_v0  ;;  %v3339_v5 = vld [vmem:[%s3299_s16 + $0x8] sm:$0xff]  ;;  %v3342_v6 = vld [vmem:[%s3299_s16 + $0x40] sm:$0xff]  ;;  %v3368_v15 = vld [vmem:[%s3307_s21 + $0x18] sm:$0xff]  ;;  %s2334_s27 = sshll.u32 %s3126_s0, 11  ;;  %s2121_s8 = sshll.u32 %s4552_s11, 4  ;;  %s4712_s8 = int_to_ptr.vmem [resolvable:$true] %s2121_s8 }
  0x83   : > { %2481 = vmatprep.subr.bf16.mxu0 %v3319_v1  ;;  %2505 = vmatprep.subr.bf16.mxu1 %v3319_v1  ;;  %v362_v7 = vpack.c.bf16 %v3339_v5, %v3336_v4  ;;  %v3347_v8 = vld [vmem:[%s3299_s16 + $0x48] sm:$0xff]  ;;  %v3355_v10 = vld [vmem:[#allocation9 + $0x20] sm:$0xff]   ;;  %v3371_v16 = vld [vmem:[%s3307_s21 + $0x10] sm:$0xff]  ;;  %v631_v18 = vmul.f32 %v3368_v15, %v3368_v15  ;;  %s4859_s28 = smov (!%p318_p3, %s2299_s28), 31  ;;  %s4710_s1 = scalar_lea.hbm %s4769_s4, %s2334_s27 }
  0x84   : > { %v495_v9 = vpack.c.bf16 %v3347_v8, %v3342_v6  ;;  %v3358_v11 = vld [vmem:[%s3307_s21 + $0x8] sm:$0xff]  ;;  %v3361_v12 = vld [vmem:[%s3307_s21] sm:$0xff]  ;;  %v630_v19 = vmul.f32 %v3371_v16, %v3371_v16  ;;  %v3393_v22 = vld [vmem:[#allocation9 + $0x30] sm:$0xff]   ;;  %s2300_s7 = sshll.u32 %s4859_s28, 3  ;;  %s2980_s30 = scalar_lea.vmem %s4712_s8, 2048 }
  0x85   : > { %2495 = vmatprep.mubr.bf16.mxu0 %v362_v7  ;;  %v629_v13 = vmul.f32 %v3358_v11, %v3358_v11  ;;  %v628_v14 = vmul.f32 %v3361_v12, %v3361_v12  ;;  %v3377_v17 = vld [vmem:[#allocation9 + $0x28] sm:$0xff]   ;;  %v3387_v21 = vld [vmem:[%s3307_s21 + $0x20] sm:$0xff]  ;;  %v3400_v25 = vld [vmem:[%s3307_s21 + $0x38] sm:$0xff]  ;;  %s4478_s12 = scalar_lea.vmem %s4770_s5, %s2300_s7  ;;  %s4537_s18 = scalar_lea.vmem %s4771_s6, %s2300_s7 }
  0x86   : > { %2482 = vmatpush3.bf16.msra.mxu0 %v3319_v1  ;;  %2506 = vmatpush3.bf16.msra.mxu1 %v3319_v1  ;;  %v3384_v20 = vld [vmem:[%s3307_s21 + $0x28] sm:$0xff]  ;;  %v632_v24 = vmul.f32 %v3387_v21, %v3387_v21  ;;  %v3403_v26 = vld [vmem:[%s3307_s21 + $0x30] sm:$0xff]  ;;  %v3409_v27 = vld [vmem:[#allocation9 + $0x38] sm:$0xff]   ;;  %v635_v29 = vmul.f32 %v3400_v25, %v3400_v25  ;;  %p2981_p7 = scmp.ne.s32.totalorder %s4712_s8, %s2980_s30 }
  0x87   : > { %2483 = vmatprep.subr.bf16.mxu0 %v3327_v2  ;;  %2507 = vmatprep.subr.bf16.mxu1 %v3327_v2  ;;  %v633_v23 = vmul.f32 %v3384_v20, %v3384_v20  ;;  %v3412_v28 = vld [vmem:[%s3299_s16 + $0x10] sm:$0xff]  ;;  %v634_v30 = vmul.f32 %v3403_v26, %v3403_v26  ;;  %v3419_v31 = vld [vmem:[%s3299_s16 + $0x18] sm:$0xff]  ;;  %v3422_v32 = vld [vmem:[%s3307_s21 + $0x48] sm:$0xff] }
  0x88   : > { %2519 = vmatprep.mubr.bf16.mxu1 %v495_v9  ;;  %638 = vadd.xlane.f32.xlu1 %v629_v13  ;;  %v3425_v33 = vld [vmem:[%s3307_s21 + $0x40] sm:$0xff]  ;;  %v3430_v34 = vld [vmem:[%s3299_s16 + $0x50] sm:$0xff]  ;;  %v3433_v35 = vld [vmem:[%s3299_s16 + $0x58] sm:$0xff]  ;;  %v661_v40 = vmul.f32 %v3422_v32, %v3422_v32  ;;  %v363_v42 = vpack.c.bf16 %v3419_v31, %v3412_v28  ;;  %p2982_p9 = pnand %p2981_p7, %p3196_p12 }
  0x89   : > { %636 = vadd.xlane.f32.xlu0 %v628_v14  ;;  %v3436_v36 = vld [vmem:[%s3299_s16 + $0x20] sm:$0xff]  ;;  %v3441_v37 = vld [vmem:[%s3299_s16 + $0x28] sm:$0xff]  ;;  %v660_v41 = vmul.f32 %v3425_v33, %v3425_v33  ;;  %v496_v43 = vpack.c.bf16 %v3433_v35, %v3430_v34  ;;  %v3464_v46 = vld [vmem:[%s3307_s21 + $0x58] sm:$0xff] }
  0x8a   : > { %2484 = vmatpush3.bf16.msra.mxu0 %v3327_v2  ;;  %2508 = vmatpush3.bf16.msra.mxu1 %v3327_v2  ;;  %v3444_v38 = vld [vmem:[%s3299_s16 + $0x60] sm:$0xff]  ;;  %v3447_v39 = vld [vmem:[%s3299_s16 + $0x68] sm:$0xff]  ;;  %v364_v44 = vpack.c.bf16 %v3441_v37, %v3436_v36  ;;  %v3467_v47 = vld [vmem:[%s3307_s21 + $0x50] sm:$0xff]  ;;  %v663_v49 = vmul.f32 %v3464_v46, %v3464_v46  ;;  %p2983_p1 = pneg %p2982_p9 }
  0x8b   : > { %2485 = vmatprep.subr.bf16.mxu0 %v3331_v3  ;;  %2509 = vmatprep.subr.bf16.mxu1 %v3331_v3  ;;  %v497_v45 = vpack.c.bf16 %v3447_v39, %v3444_v38  ;;  %v3472_v48 = vld [vmem:[%s3299_s16 + $0x30] sm:$0xff]  ;;  %v662_v50 = vmul.f32 %v3467_v47, %v3467_v47  ;;  %v3479_v51 = vld [vmem:[%s3299_s16 + $0x38] sm:$0xff]  ;;  %v3490_v54 = vld [vmem:[%s3307_s21 + $0x68] sm:$0xff] }
  0x8c   : > { %642 = vadd.xlane.f32.xlu1 %v631_v18  ;;  %v3482_v52 = vld [vmem:[%s3299_s16 + $0x70] sm:$0xff]  ;;  %v3485_v53 = vld [vmem:[%s3299_s16 + $0x78] sm:$0xff]  ;;  %v3493_v55 = vld [vmem:[%s3307_s21 + $0x60] sm:$0xff]  ;;  %v365_v56 = vpack.c.bf16 %v3479_v51, %v3472_v48  ;;  %v665_v58 = vmul.f32 %v3490_v54, %v3490_v54 }
  0x8d   : > { %640 = vadd.xlane.f32.xlu0 %v630_v19  ;;  %v498_v57 = vpack.c.bf16 %v3485_v53, %v3482_v52  ;;  %v664_v59 = vmul.f32 %v3493_v55, %v3493_v55  ;;  %v3508_v60 = vld [vmem:[%s3307_s21 + $0x78] sm:$0xff]  ;;  %v3511_v61 = vld [vmem:[%s3307_s21 + $0x70] sm:$0xff]  ;;  %s3064_s21 = smov [#allocation10]  }
  0x8e   : > { %2486 = vmatpush3.bf16.msra.mxu0 %v3331_v3  ;;  %2510 = vmatpush3.bf16.msra.mxu1 %v3331_v3  ;;  %v667_v62 = vmul.f32 %v3508_v60, %v3508_v60  ;;  %v666_v63 = vmul.f32 %v3511_v61, %v3511_v61  ;;  %s2984_s28 = sshll.u32 %s3064_s21, 4  ;;  %s2985_s28 = int_to_ptr.vmem [resolvable:$false] %s2984_s28 }
  0x8f   : > { %2487 = vmatprep.subr.bf16.mxu0 %v3355_v10  ;;  %2511 = vmatprep.subr.bf16.mxu1 %v3355_v10  ;;  %s2986_s7 = scalar_lea.vmem %s2985_s28, 4096  ;;  %p2987_p5 = scmp.lt.s32.totalorder %s4712_s8, %s2985_s28 }
  0x90   : > { %646 = vadd.xlane.f32.xlu1 %v633_v23  ;;  %p2988_p2 = scmp.lt.s32.totalorder %s2986_s7, %s2980_s30 }
  0x91   : > { %644 = vadd.xlane.f32.xlu0 %v632_v24 }
  0x92   : > { %2488 = vmatpush3.bf16.msra.mxu0 %v3355_v10  ;;  %2512 = vmatpush3.bf16.msra.mxu1 %v3355_v10  ;;  %p2989_p6 = por %p2988_p2, %p2987_p5 }
  0x93   : > { %2489 = vmatprep.subr.bf16.mxu0 %v3377_v17  ;;  %2513 = vmatprep.subr.bf16.mxu1 %v3377_v17 }
  0x94   : > { %650 = vadd.xlane.f32.xlu1 %v635_v29  ;;  %p2990_p8 = pnand %p2989_p6, %p2983_p1 }
  0x95   : > { %648 = vadd.xlane.f32.xlu0 %v634_v30 }
  0x96   : > { %2490 = vmatpush3.bf16.msra.mxu0 %v3377_v17  ;;  %2514 = vmatpush3.bf16.msra.mxu1 %v3377_v17 }
  0x97   : > { %2491 = vmatprep.subr.bf16.mxu0 %v3393_v22  ;;  %2515 = vmatprep.subr.bf16.mxu1 %v3393_v22 }
  0x98   : > { %670 = vadd.xlane.f32.xlu1 %v661_v40 }
  0x99   : > { %668 = vadd.xlane.f32.xlu0 %v660_v41 }
  0x9a   : > { %2492 = vmatpush3.bf16.msra.mxu0 %v3393_v22  ;;  %2516 = vmatpush3.bf16.msra.mxu1 %v3393_v22 }
  0x9b   : > { %2493 = vmatprep.subr.bf16.mxu0 %v3409_v27  ;;  %2517 = vmatprep.subr.bf16.mxu1 %v3409_v27 }
  0x9c   : > { %674 = vadd.xlane.f32.xlu1 %v663_v49 }
  0x9d   : > { %672 = vadd.xlane.f32.xlu0 %v662_v50 }
  0x9e   : > { %2494 = vmatpush3.bf16.msra.mxu0 %v3409_v27  ;;  %2518 = vmatpush3.bf16.msra.mxu1 %v3409_v27 }
  0x9f   : > { %2527 = vmatprep.subr.bf16.mxu0 %v3317_v0  ;;  %2551 = vmatprep.subr.bf16.mxu1 %v3317_v0 }
  0xa0   : > { %678 = vadd.xlane.f32.xlu1 %v665_v58 }
  0xa1   : > { %2496 = vmatmul.mubr.bf16.vlgmr.msra.gmra.mrb[0].mxu0 %v363_v42  ;;  %2520 = vmatmul.mubr.bf16.vlgmr.msra.gmra.mrb[0].mxu1 %v496_v43 }
  0xa2   : > { %2499 = vmatprep.mubr.bf16.mxu0 %v364_v44  ;;  %2523 = vmatprep.mubr.bf16.mxu1 %v497_v45 }
  0xa3   : > { %2528 = vmatpush3.bf16.msra.mxu0 %v3317_v0  ;;  %2552 = vmatpush3.bf16.msra.mxu1 %v3317_v0 }
  0xa4   : > { %2529 = vmatprep.subr.bf16.mxu0 %v3319_v1  ;;  %2553 = vmatprep.subr.bf16.mxu1 %v3319_v1 }
  0xa5   : > { %676 = vadd.xlane.f32.xlu0 %v664_v59  ;;  %682 = vadd.xlane.f32.xlu1 %v667_v62 }
  0xa7   : > { %2530 = vmatpush3.bf16.msra.mxu0 %v3319_v1  ;;  %2554 = vmatpush3.bf16.msra.mxu1 %v3319_v1 }
  0xa8   : > { %2531 = vmatprep.subr.bf16.mxu0 %v3327_v2  ;;  %2555 = vmatprep.subr.bf16.mxu1 %v3327_v2 }
  0xa9   : > { %2500 = vmatmul.mubr.bf16.gmra.mrb[4].mxu0 %v365_v56  ;;  %2524 = vmatmul.mubr.bf16.gmra.mrb[4].mxu1 %v498_v57 }
  0xaa   : > { %680 = vadd.xlane.f32.xlu0 %v666_v63 }
  0xab   : > { %2532 = vmatpush3.bf16.msra.mxu0 %v3327_v2  ;;  %2556 = vmatpush3.bf16.msra.mxu1 %v3327_v2 }
  0xac   : > { %2533 = vmatprep.subr.bf16.mxu0 %v3331_v3  ;;  %2557 = vmatprep.subr.bf16.mxu1 %v3331_v3 }
  0xaf   : > { %2534 = vmatpush3.bf16.msra.mxu0 %v3331_v3  ;;  %2558 = vmatpush3.bf16.msra.mxu1 %v3331_v3 }
  0xb0   : > { %2535 = vmatprep.subr.bf16.mxu0 %v3355_v10  ;;  %2559 = vmatprep.subr.bf16.mxu1 %v3355_v10 }
  0xb3   : > { %2536 = vmatpush3.bf16.msra.mxu0 %v3355_v10  ;;  %2560 = vmatpush3.bf16.msra.mxu1 %v3355_v10 }
  0xb4   : > { %2561 = vmatprep.subr.bf16.mxu1 %v3377_v17  ;;  %2537 = vmatprep.subr.bf16.mxu0 %v3377_v17 }
  0xb7   : > { %2538 = vmatpush3.bf16.msra.mxu0 %v3377_v17  ;;  %2562 = vmatpush3.bf16.msra.mxu1 %v3377_v17 }
  0xb8   : > { %2539 = vmatprep.subr.bf16.mxu0 %v3393_v22  ;;  %2563 = vmatprep.subr.bf16.mxu1 %v3393_v22 }
  0xbb   : > { %2540 = vmatpush3.bf16.msra.mxu0 %v3393_v22  ;;  %2564 = vmatpush3.bf16.msra.mxu1 %v3393_v22 }
  0xbc   : > { %2541 = vmatprep.subr.bf16.mxu0 %v3409_v27  ;;  %2565 = vmatprep.subr.bf16.mxu1 %v3409_v27 }
  0xbf   : > { %2542 = vmatpush3.bf16.msra.mxu0 %v3409_v27  ;;  %2566 = vmatpush3.bf16.msra.mxu1 %v3409_v27 }
  0xc0   : > { %2575 = vmatprep.subr.bf16.mxu0 %v3317_v0  ;;  %2599 = vmatprep.subr.bf16.mxu1 %v3317_v0 }
 0x174   : > { %v2497_v7 = vpop.f32.mrb[0].mxu0  ;;  %v2521_v9 = vpop.f32.mrb[0].mxu1 }
 0x175   : > { %v694_v13 = vmul.f32 0.025, %v2497_v7  ;;  %v710_v14 = vmul.f32 0.025, %v2521_v9  ;;  %v464_v18 = vpop.f32.mrb[1].mxu0  ;;  %v533_v19 = vpop.f32.mrb[1].mxu1  ;;  %v598_v23 = vmul.f32 %v2521_v9, %v3430_v34  ;;  %v566_v24 = vmul.f32 %v2497_v7, %v3412_v28 }
 0x176   : > { %v692_v29 = vmul.f32 0.025, %v464_v18  ;;  %v708_v30 = vmul.f32 0.025, %v533_v19  ;;  %v2498_v40 = vpop.f32.mrb[2].mxu0  ;;  %v2522_v41 = vpop.f32.mrb[2].mxu1  ;;  %v564_v42 = vmul.f32 %v464_v18, %v3336_v4  ;;  %v596_v43 = vmul.f32 %v533_v19, %v3342_v6 }
 0x177   : > { %v3548_v44 = vsub.f32 %v3371_v16, %v694_v13  ;;  %v3551_v45 = vsub.f32 %v3467_v47, %v710_v14  ;;  %v695_v49 = vmul.f32 0.025, %v2498_v40  ;;  %v711_v50 = vmul.f32 0.025, %v2522_v41  ;;  %608 = vadd.xlane.f32.xlu0 %v598_v23  ;;  %v3553_v56 = vpop.f32.mrb[3].mxu1  ;;  %576 = vadd.xlane.f32.xlu1 %v566_v24  ;;  %v3555_v57 = vpop.f32.mrb[3].mxu0 }
 0x178   : > { %v3558_v58 = vsub.f32 %v3361_v12, %v692_v29  ;;  %v3561_v59 = vsub.f32 %v3425_v33, %v708_v30  ;;  %v709_v16 = vmul.f32 0.025, %v3553_v56  ;;  %v693_v62 = vmul.f32 0.025, %v3555_v57 }
 0x179   : > { %v726_v47 = vmul.f32 0.05, %v3548_v44  ;;  %v742_v63 = vmul.f32 0.05, %v3551_v45  ;;  %v3568_v7 = vsub.f32 %v3368_v15, %v695_v49  ;;  %v3571_v9 = vsub.f32 %v3464_v46, %v711_v50 }
 0x17a   : > { %v724_v12 = vmul.f32 0.05, %v3558_v58  ;;  %v740_v13 = vmul.f32 0.05, %v3561_v59  ;;  %v3576_v33 = vsub.f32 %v3422_v32, %v709_v16  ;;  %v3579_v14 = vsub.f32 %v3358_v11, %v693_v62 }
 0x17b   : > { %4798 = vst [vmem:[#allocation15_spill] sm:$0xff] %v3571_v9  ;;  %v3582_v18 = vadd.f32 %v726_v47, %v3412_v28  ;;  %v3585_v19 = vadd.f32 %v742_v63, %v3430_v34  ;;  %v727_v15 = vmul.f32 0.05, %v3568_v7  ;;  %v743_v46 = vmul.f32 0.05, %v3571_v9  ;;  %572 = vadd.xlane.f32.xlu0 %v564_v42 }
 0x17c   : > { %4799 = vst [vmem:[#allocation16_spill] sm:$0xff] %v3576_v33  ;;  %v741_v23 = vmul.f32 0.05, %v3576_v33  ;;  %v725_v24 = vmul.f32 0.05, %v3579_v14  ;;  %v567_v32 = vmul.f32 %v2498_v40, %v3419_v31  ;;  %v3592_v29 = vpop.f32.mrb[4].mxu0  ;;  %v599_v28 = vmul.f32 %v2522_v41, %v3433_v35 }
 0x17d   : > { %4800 = vst [vmem:[#allocation17_spill] sm:$0xff] %v3585_v19  ;;  %v3594_v11 = vpop.f32.mrb[4].mxu1  ;;  %v3598_v34 = vadd.f32 %v727_v15, %v3419_v31  ;;  %v3601_v30 = vadd.f32 %v743_v46, %v3433_v35  ;;  %v698_v42 = vmul.f32 0.025, %v3592_v29  ;;  %v3605_v50 = vpop.f32.mrb[5].mxu0  ;;  %v3612_v31 = vadd.f32 %v724_v12, %v3336_v4 }
 0x17e   : > { %v714_v49 = vmul.f32 0.025, %v3594_v11  ;;  %v3607_v16 = vpop.f32.mrb[5].mxu1  ;;  %578 = vadd.xlane.f32.xlu1 %v567_v32  ;;  %v696_v40 = vmul.f32 0.025, %v3605_v50  ;;  %v2502_v41 = vpop.f32.mrb[6].mxu0  ;;  %v3615_v35 = vadd.f32 %v725_v24, %v3339_v5 }
 0x17f   : > { %4801 = vst [vmem:[#allocation18_spill] sm:$0xff] %v3598_v34  ;;  %v712_v62 = vmul.f32 0.025, %v3607_v16  ;;  %v2526_v47 = vpop.f32.mrb[6].mxu1  ;;  %v757_v63 = vpack.c.bf16 %v3598_v34, %v3582_v18  ;;  %v826_v15 = vpack.c.bf16 %v3601_v30, %v3585_v19  ;;  %v3622_v46 = vsub.f32 %v3403_v26, %v698_v42  ;;  %604 = vadd.xlane.f32.xlu0 %v596_v43  ;;  %v483_v4 = vpop.f32.mrb[7].mxu0 }
 0x180   : > { %v3625_v32 = vsub.f32 %v3511_v61, %v714_v49  ;;  %v3627_v33 = vpop.f32.mrb[7].mxu1  ;;  %v3630_v12 = vsub.f32 %v3387_v21, %v696_v40  ;;  %v699_v9 = vmul.f32 0.025, %v2502_v41  ;;  %v715_v34 = vmul.f32 0.025, %v2526_v47 }
 0x181   : > { %4802 = vst [vmem:[#allocation19_spill] sm:$0xff] %v3622_v46  ;;  %v3633_v24 = vsub.f32 %v3493_v55, %v712_v62  ;;  %v730_v19 = vmul.f32 0.05, %v3622_v46  ;;  %v713_v42 = vmul.f32 0.025, %v3627_v33  ;;  %v756_v61 = vpack.c.bf16 %v3615_v35, %v3612_v31 }
 0x182   : > { %4803 = vst [vmem:[#allocation20_spill] sm:$0xff] %v3625_v32  ;;  %v746_v26 = vmul.f32 0.05, %v3625_v32  ;;  %v728_v43 = vmul.f32 0.05, %v3630_v12  ;;  %v3643_v21 = vsub.f32 %v3400_v25, %v699_v9  ;;  %v3646_v55 = vsub.f32 %v3508_v60, %v715_v34  ;;  %610 = vadd.xlane.f32.xlu1 %v599_v28 }
 0x183   : > { %4804 = vst [vmem:[#allocation21_spill] sm:$0xff] %v3633_v24  ;;  %v744_v49 = vmul.f32 0.05, %v3633_v24  ;;  %v3649_v40 = vsub.f32 %v3490_v54, %v713_v42  ;;  %v697_v62 = vmul.f32 0.025, %v483_v4  ;;  %2543 = vmatprep.mubr.bf16.mxu0 %v756_v61  ;;  %v3652_v32 = vadd.f32 %v740_v13, %v3342_v6 }
 0x184   : > { %v3655_v46 = vadd.f32 %v741_v23, %v3347_v8  ;;  %v731_v24 = vmul.f32 0.05, %v3643_v21  ;;  %v747_v25 = vmul.f32 0.05, %v3646_v55  ;;  %v597_v60 = vmul.f32 %v3553_v56, %v3347_v8  ;;  %2544 = vmatmul.mubr.bf16.vlgmr.msra.gmra.mrb[8].mxu0 %v757_v63 }
 0x185   : > { %v565_v54 = vmul.f32 %v3555_v57, %v3339_v5  ;;  %v745_v9 = vmul.f32 0.05, %v3649_v40  ;;  %v3665_v28 = vsub.f32 %v3384_v20, %v697_v62  ;;  %2576 = vmatpush3.bf16.msra.mxu0 %v3317_v0  ;;  %v3671_v13 = vadd.f32 %v744_v49, %v3444_v38 }
 0x186   : > { %v825_v6 = vpack.c.bf16 %v3655_v46, %v3652_v32  ;;  %606 = vadd.xlane.f32.xlu1 %v597_v60  ;;  %v3674_v8 = vadd.f32 %v730_v19, %v3472_v48  ;;  %v3677_v5 = vadd.f32 %v731_v24, %v3479_v51  ;;  %v3681_v20 = vadd.f32 %v728_v43, %v3436_v36 }
 0x187   : > { %574 = vadd.xlane.f32.xlu0 %v565_v54  ;;  %v729_v56 = vmul.f32 0.05, %v3665_v28  ;;  %v3684_v57 = vadd.f32 %v745_v9, %v3447_v39  ;;  %2577 = vmatprep.subr.bf16.mxu0 %v3319_v1  ;;  %v3688_v23 = vadd.f32 %v746_v26, %v3482_v52  ;;  %v3691_v19 = vadd.f32 %v747_v25, %v3485_v53 }
 0x188   : > { %2567 = vmatprep.mubr.bf16.mxu1 %v825_v6  ;;  %v570_v34 = vmul.f32 %v3592_v29, %v3472_v48  ;;  %v571_v63 = vmul.f32 %v2502_v41, %v3479_v51  ;;  %v602_v26 = vmul.f32 %v3594_v11, %v3482_v52  ;;  %v603_v51 = vmul.f32 %v2526_v47, %v3485_v53 }
 0x189   : > { %2568 = vmatmul.mubr.bf16.vlgmr.msra.gmra.mrb[8].mxu1 %v826_v15  ;;  %v3697_v24 = vadd.f32 %v729_v56, %v3441_v37  ;;  %v827_v42 = vpack.c.bf16 %v3684_v57, %v3671_v13  ;;  %v759_v15 = vpack.c.bf16 %v3677_v5, %v3674_v8  ;;  %v828_v29 = vpack.c.bf16 %v3691_v19, %v3688_v23 }
 0x18a   : > { %2600 = vmatpush3.bf16.msra.mxu1 %v3317_v0  ;;  %586 = vadd.xlane.f32.xlu1 %v571_v63  ;;  %v568_v52 = vmul.f32 %v3605_v50, %v3436_v36  ;;  %v569_v11 = vmul.f32 %v483_v4, %v3441_v37  ;;  %v600_v53 = vmul.f32 %v3607_v16, %v3444_v38  ;;  %v3747_v37 = vpop.xlane.xlu0 %636  ;;  %v3749_v38 = vpop.xlane.xlu1 %638 }
 0x18b   : > { %584 = vadd.xlane.f32.xlu0 %v570_v34  ;;  %v758_v48 = vpack.c.bf16 %v3697_v24, %v3681_v20  ;;  %2571 = vmatprep.mubr.bf16.mxu1 %v827_v42  ;;  %v601_v36 = vmul.f32 %v3627_v33, %v3447_v39  ;;  %4805 = vst [vmem:[#allocation22_spill] sm:$0xff] %v3747_v37  ;;  %4806 = vst [vmem:[#allocation23_spill] sm:$0xff] %v3749_v38 }
 0x18c   : > { %2601 = vmatprep.subr.bf16.mxu1 %v3319_v1  ;;  %2578 = vmatpush3.bf16.msra.mxu0 %v3319_v1 }
 0x18d   : > { %2547 = vmatprep.mubr.bf16.mxu0 %v758_v48  ;;  %2579 = vmatprep.subr.bf16.mxu0 %v3327_v2 }
 0x18e   : > { %2602 = vmatpush3.bf16.msra.mxu1 %v3319_v1  ;;  %2548 = vmatmul.mubr.bf16.gmra.mrb[12].mxu0 %v759_v15  ;;  %v3751_v39 = vpop.xlane.xlu0 %640  ;;  %v3753_v33 = vpop.xlane.xlu1 %642 }
 0x18f   : > { %616 = vadd.xlane.f32.xlu0 %v602_v26  ;;  %618 = vadd.xlane.f32.xlu1 %v603_v51 }
 0x190   : > { %2603 = vmatprep.subr.bf16.mxu1 %v3327_v2  ;;  %2580 = vmatpush3.bf16.msra.mxu0 %v3327_v2 }
 0x191   : > { %2572 = vmatmul.mubr.bf16.gmra.mrb[12].mxu1 %v828_v29  ;;  %2581 = vmatprep.subr.bf16.mxu0 %v3331_v3 }
 0x192   : > { %2604 = vmatpush3.bf16.msra.mxu1 %v3327_v2  ;;  %v3755_v50 = vpop.xlane.xlu0 %644  ;;  %v3757_v16 = vpop.xlane.xlu1 %646 }
 0x193   : > { %580 = vadd.xlane.f32.xlu0 %v568_v52  ;;  %582 = vadd.xlane.f32.xlu1 %v569_v11  ;;  %4807 = vst [vmem:[#allocation24_spill] sm:$0xff] %v3755_v50  ;;  %4808 = vst [vmem:[#allocation25_spill] sm:$0xff] %v3757_v16 }
 0x194   : > { %2605 = vmatprep.subr.bf16.mxu1 %v3331_v3  ;;  %2582 = vmatpush3.bf16.msra.mxu0 %v3331_v3 }
 0x195   : > { %2583 = vmatprep.subr.bf16.mxu0 %v3355_v10 }
 0x196   : > { %2606 = vmatpush3.bf16.msra.mxu1 %v3331_v3  ;;  %v649_v41 = vpop.xlane.xlu0 %648  ;;  %v651_v47 = vpop.xlane.xlu1 %650 }
 0x197   : > { %612 = vadd.xlane.f32.xlu0 %v600_v53  ;;  %614 = vadd.xlane.f32.xlu1 %v601_v36  ;;  %v659_v48 = vmul.f32 0.5, %v651_v47  ;;  %v658_v51 = vmul.f32 0.5, %v649_v41 }
 0x198   : > { %2607 = vmatprep.subr.bf16.mxu1 %v3355_v10  ;;  %2584 = vmatpush3.bf16.msra.mxu0 %v3355_v10 }
 0x199   : > { %2585 = vmatprep.subr.bf16.mxu0 %v3377_v17 }
 0x19a   : > { %2608 = vmatpush3.bf16.msra.mxu1 %v3355_v10  ;;  %v3759_v4 = vpop.xlane.xlu0 %668  ;;  %v3761_v61 = vpop.xlane.xlu1 %670 }
 0x19b   : > { %2609 = vmatprep.subr.bf16.mxu1 %v3377_v17  ;;  %4809 = vst [vmem:[#allocation26_spill] sm:$0xff] %v3759_v4  ;;  %4810 = vst [vmem:[#allocation27_spill] sm:$0xff] %v3761_v61 }
 0x19c   : > { %2586 = vmatpush3.bf16.msra.mxu0 %v3377_v17 }
 0x19d   : > { %2587 = vmatprep.subr.bf16.mxu0 %v3393_v22 }
 0x19e   : > { %2610 = vmatpush3.bf16.msra.mxu1 %v3377_v17  ;;  %v3763_v43 = vpop.xlane.xlu0 %672  ;;  %v3765_v49 = vpop.xlane.xlu1 %674 }
 0x19f   : > { %2611 = vmatprep.subr.bf16.mxu1 %v3393_v22  ;;  %4811 = vst [vmem:[#allocation28_spill] sm:$0xff] %v3765_v49 }
 0x1a0   : > { %2588 = vmatpush3.bf16.msra.mxu0 %v3393_v22 }
 0x1a1   : > { %2589 = vmatprep.subr.bf16.mxu0 %v3409_v27 }
 0x1a2   : > { %2612 = vmatpush3.bf16.msra.mxu1 %v3393_v22  ;;  %v3767_v62 = vpop.xlane.xlu0 %676  ;;  %v3769_v25 = vpop.xlane.xlu1 %678 }
 0x1a3   : > { %2613 = vmatprep.subr.bf16.mxu1 %v3409_v27  ;;  %4812 = vst [vmem:[#allocation29_spill] sm:$0xff] %v3767_v62  ;;  %4813 = vst [vmem:[#allocation30_spill] sm:$0xff] %v3769_v25 }
 0x1a4   : > { %2590 = vmatpush3.bf16.msra.mxu0 %v3409_v27 }
 0x1a5   : > { %2623 = vmatprep.subr.bf16.mxu0 %v3317_v0 }
 0x1a6   : > { %2614 = vmatpush3.bf16.msra.mxu1 %v3409_v27  ;;  %v3771_v60 = vpop.xlane.xlu0 %680  ;;  %v3773_v54 = vpop.xlane.xlu1 %682 }
 0x1a7   : > { %2647 = vmatprep.subr.bf16.mxu1 %v3317_v0  ;;  %4814 = vst [vmem:[#allocation31_spill] sm:$0xff] %v3771_v60  ;;  %4815 = vst [vmem:[#allocation32_spill] sm:$0xff] %v3773_v54 }
 0x204   : > { %v3775_v9 = vpop.xlane.xlu0 %608  ;;  %v3777_v6 = vpop.xlane.xlu1 %576 }
 0x205   : > { %4816 = vst [vmem:[#allocation33_spill] sm:$0xff] %v3775_v9  ;;  %v4828_v9 = vld [vmem:[#allocation17_spill] sm:$0xff] }
 0x208   : > { %v3779_v56 = vpop.xlane.xlu0 %572 }
 0x209   : > { %4817 = vst [vmem:[#allocation34_spill] sm:$0xff] %v3779_v56 }
 0x20b   : > { %v3781_v34 = vpop.xlane.xlu1 %578 }
 0x20c   : > { %v3783_v63 = vpop.xlane.xlu0 %604 }
 0x20d   : > { %4818 = vst [vmem:[#allocation35_spill] sm:$0xff] %v3783_v63 }
 0x20f   : > { %v3785_v42 = vpop.xlane.xlu1 %610 }
 0x210   : > { %4819 = vst [vmem:[#allocation36_spill] sm:$0xff] %v3785_v42 }
 0x213   : > { %v3787_v15 = vpop.xlane.xlu1 %606 }
 0x214   : > { %4820 = vst [vmem:[#allocation37_spill] sm:$0xff] %v3787_v15  ;;  %v3789_v26 = vpop.xlane.xlu0 %574 }
 0x215   : > { %4821 = vst [vmem:[#allocation38_spill] sm:$0xff] %v3789_v26 }
 0x217   : > { %v587_v52 = vpop.xlane.xlu1 %586 }
 0x218   : > { %v585_v29 = vpop.xlane.xlu0 %584  ;;  %v595_v53 = vmul.f32 0.5, %v587_v52 }
 0x219   : > { %v594_v11 = vmul.f32 0.5, %v585_v29 }
 0x21a   : > { %v3793_v54 = vadd.f32 %v659_v48, %v595_v53 }
 0x21b   : > { %v3791_v36 = vadd.f32 %v658_v51, %v594_v11 }
 0x21c   : > { %4823 = vst [vmem:[#allocation40_spill] sm:$0xff] %v3793_v54 }
 0x21d   : > { %4822 = vst [vmem:[#allocation39_spill] sm:$0xff] %v3791_v36 }
 0x257   : > { %v2545_v60 = vpop.f32.mrb[8].mxu0 }
 0x258   : > { %v896_v25 = vmul.f32 0.05, %v2545_v60  ;;  %v794_v62 = vpop.f32.mrb[9].mxu0 }
 0x259   : > { %v894_v16 = vmul.f32 0.05, %v794_v62  ;;  %v2546_v50 = vpop.f32.mrb[10].mxu0 }
 0x25a   : > { %v3796_v61 = vsub.f32 %v3548_v44, %v896_v25  ;;  %v897_v15 = vmul.f32 0.05, %v2546_v50  ;;  %v797_v63 = vpop.f32.mrb[11].mxu0 }
 0x25b   : > { %v3799_v41 = vsub.f32 %v3558_v58, %v894_v16  ;;  %v895_v29 = vmul.f32 0.05, %v797_v63 }
 0x25c   : > { %v2569_v47 = vpop.f32.mrb[8].mxu1  ;;  %v928_v51 = vmul.f32 0.05, %v3796_v61  ;;  %v3803_v11 = vsub.f32 %v3568_v7, %v897_v15 }
 0x25d   : > { %v912_v52 = vmul.f32 0.05, %v2569_v47  ;;  %v863_v48 = vpop.f32.mrb[9].mxu1  ;;  %v926_v62 = vmul.f32 0.05, %v3799_v41  ;;  %v3807_v44 = vsub.f32 %v3579_v14, %v895_v29  ;;  %v4825_v14 = vld [vmem:[#allocation15_spill] sm:$0xff] }
 0x25e   : > { %v910_v60 = vmul.f32 0.05, %v863_v48  ;;  %v2570_v53 = vpop.f32.mrb[10].mxu1  ;;  %v929_v58 = vmul.f32 0.05, %v3803_v11  ;;  %v3818_v47 = vadd.f32 %v928_v51, %v3582_v18  ;;  %v4824_v48 = vld [vmem:[#allocation18_spill] sm:$0xff] }
 0x25f   : > { %v3810_v50 = vsub.f32 %v3551_v45, %v912_v52  ;;  %v913_v16 = vmul.f32 0.05, %v2570_v53  ;;  %v866_v25 = vpop.f32.mrb[11].mxu1  ;;  %v927_v7 = vmul.f32 0.05, %v3807_v44  ;;  %v3827_v45 = vadd.f32 %v926_v62, %v3612_v31 }
 0x260   : > { %v3814_v63 = vsub.f32 %v3561_v59, %v910_v60  ;;  %v911_v15 = vmul.f32 0.05, %v866_v25  ;;  %v3821_v54 = vadd.f32 %v929_v58, %v4824_v48  ;;  %v4826_v60 = vld [vmem:[#allocation16_spill] sm:$0xff] }
 0x261   : > { %v3824_v29 = vsub.f32 %v4825_v14, %v913_v16  ;;  %v944_v52 = vmul.f32 0.05, %v3810_v50  ;;  %v2549_v25 = vpop.f32.mrb[12].mxu0  ;;  %v3835_v18 = vadd.f32 %v927_v7, %v3615_v35  ;;  %v4827_v35 = vld [vmem:[#allocation19_spill] sm:$0xff] }
 0x262   : > { %v942_v59 = vmul.f32 0.05, %v3814_v63  ;;  %v3832_v53 = vsub.f32 %v4826_v60, %v911_v15  ;;  %v900_v58 = vmul.f32 0.05, %v2549_v25  ;;  %v810_v48 = vpop.f32.mrb[13].mxu0  ;;  %v959_v16 = vpack.c.bf16 %v3821_v54, %v3818_v47 }
 0x263   : > { %v945_v51 = vmul.f32 0.05, %v3824_v29  ;;  %v898_v14 = vmul.f32 0.05, %v810_v48  ;;  %v2550_v36 = vpop.f32.mrb[14].mxu0  ;;  %v958_v15 = vpack.c.bf16 %v3835_v18, %v3827_v45 }
 0x264   : > { %v943_v31 = vmul.f32 0.05, %v3832_v53  ;;  %v2573_v62 = vpop.f32.mrb[12].mxu1  ;;  %v3847_v7 = vsub.f32 %v4827_v35, %v900_v58  ;;  %v901_v26 = vmul.f32 0.05, %v2550_v36  ;;  %v813_v38 = vpop.f32.mrb[15].mxu0 }
 0x265   : > { %v3844_v60 = vadd.f32 %v945_v51, %v3601_v30  ;;  %v916_v4 = vmul.f32 0.05, %v2573_v62  ;;  %v879_v25 = vpop.f32.mrb[13].mxu1  ;;  %v3850_v56 = vsub.f32 %v3630_v12, %v898_v14  ;;  %v899_v48 = vmul.f32 0.05, %v813_v38  ;;  %2591 = vmatprep.mubr.bf16.mxu0 %v958_v15  ;;  %v4829_v51 = vld [vmem:[#allocation20_spill] sm:$0xff] }
 0x266   : > { %v914_v37 = vmul.f32 0.05, %v879_v25  ;;  %v2574_v42 = vpop.f32.mrb[14].mxu1  ;;  %v3853_v49 = vadd.f32 %v943_v31, %v3655_v46  ;;  %v3856_v30 = vadd.f32 %v944_v52, %v4828_v9  ;;  %v3862_v62 = vsub.f32 %v3643_v21, %v901_v26  ;;  %2592 = vmatmul.mubr.bf16.vlgmr.msra.gmra.mrb[16].mxu0 %v959_v16  ;;  %v4830_v14 = vld [vmem:[#allocation21_spill] sm:$0xff] }
 0x267   : > { %v3859_v58 = vsub.f32 %v4829_v51, %v916_v4  ;;  %v882_v36 = vpop.f32.mrb[15].mxu1  ;;  %v3865_v12 = vadd.f32 %v942_v59, %v3652_v32  ;;  %v930_v38 = vmul.f32 0.05, %v3850_v56  ;;  %v917_v46 = vmul.f32 0.05, %v2574_v42  ;;  %2624 = vmatpush3.bf16.msra.mxu0 %v3317_v0 }
 0x268   : > { %v3869_v15 = vsub.f32 %v4830_v14, %v914_v37  ;;  %v3872_v9 = vsub.f32 %v3665_v28, %v899_v48  ;;  %v932_v4 = vmul.f32 0.05, %v3847_v7  ;;  %v933_v21 = vmul.f32 0.05, %v3862_v62  ;;  %2625 = vmatprep.subr.bf16.mxu0 %v3319_v1 }
 0x269   : > { %v915_v26 = vmul.f32 0.05, %v882_v36  ;;  %v1027_v32 = vpack.c.bf16 %v3853_v49, %v3865_v12  ;;  %v1028_v37 = vpack.c.bf16 %v3844_v60, %v3856_v30  ;;  %v3883_v42 = vsub.f32 %v3646_v55, %v917_v46 }
 0x26a   : > { %v931_v28 = vmul.f32 0.05, %v3872_v9  ;;  %v946_v52 = vmul.f32 0.05, %v3869_v15  ;;  %v3891_v16 = vadd.f32 %v933_v21, %v3677_v5  ;;  %v948_v31 = vmul.f32 0.05, %v3859_v58 }
 0x26b   : > { %v3888_v59 = vsub.f32 %v3649_v40, %v915_v26  ;;  %2615 = vmatprep.mubr.bf16.mxu1 %v1027_v32  ;;  %v949_v35 = vmul.f32 0.05, %v3883_v42  ;;  %v3896_v25 = vadd.f32 %v930_v38, %v3681_v20  ;;  %2626 = vmatpush3.bf16.msra.mxu0 %v3319_v1  ;;  %v3904_v48 = vadd.f32 %v932_v4, %v3674_v8 }
 0x26c   : > { %2616 = vmatmul.mubr.bf16.vlgmr.msra.gmra.mrb[16].mxu1 %v1028_v37  ;;  %v3899_v55 = vadd.f32 %v931_v28, %v3697_v24  ;;  %2627 = vmatprep.subr.bf16.mxu0 %v3327_v2  ;;  %v3915_v24 = vadd.f32 %v946_v52, %v3671_v13  ;;  %v3923_v36 = vadd.f32 %v948_v31, %v3688_v23 }
 0x26d   : > { %v947_v40 = vmul.f32 0.05, %v3888_v59  ;;  %2648 = vmatpush3.bf16.msra.mxu1 %v3317_v0  ;;  %v3911_v20 = vadd.f32 %v949_v35, %v3691_v19  ;;  %v961_v8 = vpack.c.bf16 %v3891_v16, %v3904_v48 }
 0x26e   : > { %v960_v5 = vpack.c.bf16 %v3899_v55, %v3896_v25  ;;  %2649 = vmatprep.subr.bf16.mxu1 %v3319_v1 }
 0x26f   : > { %v3918_v51 = vadd.f32 %v947_v40, %v3684_v57  ;;  %2628 = vmatpush3.bf16.msra.mxu0 %v3327_v2  ;;  %v1030_v13 = vpack.c.bf16 %v3911_v20, %v3923_v36 }
 0x270   : > { %2595 = vmatprep.mubr.bf16.mxu0 %v960_v5  ;;  %2629 = vmatprep.subr.bf16.mxu0 %v3331_v3 }
 0x271   : > { %v1029_v19 = vpack.c.bf16 %v3918_v51, %v3915_v24  ;;  %2596 = vmatmul.mubr.bf16.gmra.mrb[20].mxu0 %v961_v8  ;;  %2650 = vmatpush3.bf16.msra.mxu1 %v3319_v1 }
 0x272   : > { %2651 = vmatprep.subr.bf16.mxu1 %v3327_v2 }
 0x273   : > { %2619 = vmatprep.mubr.bf16.mxu1 %v1029_v19  ;;  %2630 = vmatpush3.bf16.msra.mxu0 %v3331_v3 }
 0x274   : > { %2620 = vmatmul.mubr.bf16.gmra.mrb[20].mxu1 %v1030_v13  ;;  %2631 = vmatprep.subr.bf16.mxu0 %v3355_v10 }
 0x275   : > { %2652 = vmatpush3.bf16.msra.mxu1 %v3327_v2 }
 0x276   : > { %2653 = vmatprep.subr.bf16.mxu1 %v3331_v3 }
 0x277   : > { %2632 = vmatpush3.bf16.msra.mxu0 %v3355_v10 }
 0x278   : > { %2633 = vmatprep.subr.bf16.mxu0 %v3377_v17 }
 0x279   : > { %2654 = vmatpush3.bf16.msra.mxu1 %v3331_v3 }
 0x27a   : > { %2655 = vmatprep.subr.bf16.mxu1 %v3355_v10 }
 0x27b   : > { %2634 = vmatpush3.bf16.msra.mxu0 %v3377_v17 }
 0x27c   : > { %2635 = vmatprep.subr.bf16.mxu0 %v3393_v22 }
 0x27d   : > { %2656 = vmatpush3.bf16.msra.mxu1 %v3355_v10 }
 0x27e   : > { %2657 = vmatprep.subr.bf16.mxu1 %v3377_v17 }
 0x27f   : > { %2636 = vmatpush3.bf16.msra.mxu0 %v3393_v22 }
 0x280   : > { %2637 = vmatprep.subr.bf16.mxu0 %v3409_v27 }
 0x281   : > { %2658 = vmatpush3.bf16.msra.mxu1 %v3377_v17 }
 0x282   : > { %2659 = vmatprep.subr.bf16.mxu1 %v3393_v22 }
 0x283   : > { %2638 = vmatpush3.bf16.msra.mxu0 %v3409_v27 }
 0x284   : > { %2671 = vmatprep.subr.bf16.mxu0 %v3317_v0 }
 0x285   : > { %2660 = vmatpush3.bf16.msra.mxu1 %v3393_v22 }
 0x286   : > { %2661 = vmatprep.subr.bf16.mxu1 %v3409_v27 }
 0x289   : > { %2662 = vmatpush3.bf16.msra.mxu1 %v3409_v27 }
 0x28a   : > { %2695 = vmatprep.subr.bf16.mxu1 %v3317_v0 }
 0x339   : > { %v2593_v1 = vpop.f32.mrb[16].mxu0 }
 0x33a   : > { %v1098_v2 = vmul.f32 0.05, %v2593_v1  ;;  %v996_v3 = vpop.f32.mrb[17].mxu0 }
 0x33b   : > { %v1096_v10 = vmul.f32 0.05, %v996_v3  ;;  %v2594_v17 = vpop.f32.mrb[18].mxu0 }
 0x33c   : > { %v3956_v57 = vsub.f32 %v3796_v61, %v1098_v2  ;;  %v1099_v23 = vmul.f32 0.05, %v2594_v17  ;;  %v999_v38 = vpop.f32.mrb[19].mxu0 }
 0x33d   : > { %v3959_v22 = vsub.f32 %v3799_v41, %v1096_v10  ;;  %v1097_v14 = vmul.f32 0.05, %v999_v38 }
 0x33e   : > { %v1130_v46 = vmul.f32 0.05, %v3956_v57  ;;  %v3963_v27 = vsub.f32 %v3803_v11, %v1099_v23 }
 0x33f   : > { %v2617_v4 = vpop.f32.mrb[16].mxu1  ;;  %v1128_v21 = vmul.f32 0.05, %v3959_v22  ;;  %v3967_v32 = vsub.f32 %v3807_v44, %v1097_v14 }
 0x340   : > { %v1114_v0 = vmul.f32 0.05, %v2617_v4  ;;  %v1065_v26 = vpop.f32.mrb[17].mxu1  ;;  %v1131_v37 = vmul.f32 0.05, %v3963_v27  ;;  %v3991_v1 = vadd.f32 %v1130_v46, %v3818_v47 }
 0x341   : > { %v1112_v61 = vmul.f32 0.05, %v1065_v26  ;;  %v2618_v28 = vpop.f32.mrb[18].mxu1  ;;  %v1129_v31 = vmul.f32 0.05, %v3967_v32 }
 0x342   : > { %v3971_v41 = vsub.f32 %v3810_v50, %v1114_v0  ;;  %v1115_v52 = vmul.f32 0.05, %v2618_v28  ;;  %v1068_v35 = vpop.f32.mrb[19].mxu1  ;;  %v3978_v40 = vadd.f32 %v1131_v37, %v3821_v54  ;;  %v3985_v50 = vadd.f32 %v1128_v21, %v3827_v45 }
 0x343   : > { %v3975_v11 = vsub.f32 %v3814_v63, %v1112_v61  ;;  %v1113_v5 = vmul.f32 0.05, %v1068_v35  ;;  %v3988_v13 = vadd.f32 %v1129_v31, %v3835_v18 }
 0x344   : > { %v1146_v44 = vmul.f32 0.05, %v3971_v41  ;;  %v3982_v8 = vsub.f32 %v3824_v29, %v1115_v52  ;;  %v2597_v19 = vpop.f32.mrb[20].mxu0  ;;  %v1161_v47 = vpack.c.bf16 %v3978_v40, %v3991_v1 }
 0x345   : > { %v1144_v63 = vmul.f32 0.05, %v3975_v11  ;;  %v3995_v54 = vsub.f32 %v3832_v53, %v1113_v5  ;;  %v1102_v2 = vmul.f32 0.05, %v2597_v19  ;;  %v1012_v3 = vpop.f32.mrb[21].mxu0  ;;  %v1160_v45 = vpack.c.bf16 %v3988_v13, %v3985_v50  ;;  %v4038_v19 = vld [vmem:[#allocation9 + $0x8] sm:$0xff]  }
 0x346   : > { %v1147_v29 = vmul.f32 0.05, %v3982_v8  ;;  %v1100_v10 = vmul.f32 0.05, %v1012_v3  ;;  %v2598_v17 = vpop.f32.mrb[22].mxu0  ;;  %v4001_v18 = vadd.f32 %v1146_v44, %v3856_v30 }
 0x347   : > { %v1145_v23 = vmul.f32 0.05, %v3995_v54  ;;  %v2621_v38 = vpop.f32.mrb[20].mxu1  ;;  %v1103_v53 = vmul.f32 0.05, %v2598_v17  ;;  %v1015_v14 = vpop.f32.mrb[23].mxu0  ;;  %v4007_v46 = vsub.f32 %v3847_v7, %v1102_v2  ;;  %2639 = vmatprep.mubr.bf16.mxu0 %v1160_v45  ;;  %v4026_v5 = vadd.f32 %v1144_v63, %v3865_v12 }
 0x348   : > { %v1118_v4 = vmul.f32 0.05, %v2621_v38  ;;  %v4010_v0 = vsub.f32 %v3850_v56, %v1100_v10  ;;  %v1081_v21 = vpop.f32.mrb[21].mxu1  ;;  %v1101_v26 = vmul.f32 0.05, %v1015_v14  ;;  %v4013_v30 = vadd.f32 %v1147_v29, %v3844_v60  ;;  %2640 = vmatmul.mubr.bf16.vlgmr.msra.gmra.mrb[24].mxu0 %v1161_v47  ;;  %v4028_v60 = vld [vmem:[#allocation9] sm:$0xff]  }
 0x349   : > { %v1116_v61 = vmul.f32 0.05, %v1081_v21  ;;  %v4016_v37 = vsub.f32 %v3862_v62, %v1103_v53  ;;  %v2622_v28 = vpop.f32.mrb[22].mxu1  ;;  %v4019_v52 = vadd.f32 %v1145_v23, %v3853_v49  ;;  %2672 = vmatpush3.bf16.msra.mxu0 %v4028_v60  ;;  %v1134_v12 = vmul.f32 0.05, %v4007_v46  ;;  %v4114_v21 = vld [vmem:[#allocation9 + $0x30] sm:$0xff]  }
 0x34a   : > { %v4022_v7 = vsub.f32 %v3859_v58, %v1118_v4  ;;  %v1132_v56 = vmul.f32 0.05, %v4010_v0  ;;  %v1119_v31 = vmul.f32 0.05, %v2622_v28  ;;  %v1084_v35 = vpop.f32.mrb[23].mxu1  ;;  %v4036_v44 = vsub.f32 %v3872_v9, %v1101_v26  ;;  %2673 = vmatprep.subr.bf16.mxu0 %v4038_v19  ;;  %v4094_v4 = vld [vmem:[#allocation9 + $0x18] sm:$0xff]  }
 0x34b   : > { %v4032_v62 = vsub.f32 %v3869_v15, %v1116_v61  ;;  %v1135_v49 = vmul.f32 0.05, %v4016_v37  ;;  %v1117_v58 = vmul.f32 0.05, %v1084_v35  ;;  %v1229_v2 = vpack.c.bf16 %v4019_v52, %v4026_v5  ;;  %v4120_v26 = vld [vmem:[#allocation9 + $0x38] sm:$0xff]  }
 0x34c   : > { %v4043_v63 = vsub.f32 %v3883_v42, %v1119_v31  ;;  %v1230_v15 = vpack.c.bf16 %v4013_v30, %v4001_v18  ;;  %v1133_v9 = vmul.f32 0.05, %v4036_v44  ;;  %v1150_v42 = vmul.f32 0.05, %v4022_v7 }
 0x34d   : > { %v1148_v3 = vmul.f32 0.05, %v4032_v62  ;;  %v4052_v29 = vsub.f32 %v3888_v59, %v1117_v58  ;;  %2663 = vmatprep.mubr.bf16.mxu1 %v1229_v2  ;;  %v4056_v17 = vadd.f32 %v1135_v49, %v3891_v16  ;;  %2674 = vmatpush3.bf16.msra.mxu0 %v4038_v19  ;;  %v4062_v47 = vadd.f32 %v1132_v56, %v3896_v25  ;;  %v4067_v59 = vld [vmem:[#allocation9 + $0x10] sm:$0xff]  }
 0x34e   : > { %v1151_v10 = vmul.f32 0.05, %v4043_v63  ;;  %2664 = vmatmul.mubr.bf16.vlgmr.msra.gmra.mrb[24].mxu1 %v1230_v15  ;;  %v4065_v23 = vadd.f32 %v1133_v9, %v3899_v55  ;;  %2675 = vmatprep.subr.bf16.mxu0 %v4067_v59  ;;  %v4071_v16 = vadd.f32 %v1134_v12, %v3904_v48 }
 0x34f   : > { %v1149_v45 = vmul.f32 0.05, %v4052_v29  ;;  %2696 = vmatpush3.bf16.msra.mxu1 %v4028_v60  ;;  %v4077_v53 = vadd.f32 %v1148_v3, %v3915_v24  ;;  %v4092_v24 = vadd.f32 %v1150_v42, %v3923_v36  ;;  %v4108_v36 = vld [vmem:[#allocation9 + $0x28] sm:$0xff]  }
 0x350   : > { %v1162_v38 = vpack.c.bf16 %v4065_v23, %v4062_v47  ;;  %v4083_v55 = vadd.f32 %v1151_v10, %v3911_v20  ;;  %2697 = vmatprep.subr.bf16.mxu1 %v4038_v19  ;;  %v1163_v48 = vpack.c.bf16 %v4056_v17, %v4071_v16 }
 0x351   : > { %v4080_v25 = vadd.f32 %v1149_v45, %v3918_v51  ;;  %2676 = vmatpush3.bf16.msra.mxu0 %v4067_v59  ;;  %v4102_v51 = vld [vmem:[#allocation9 + $0x20] sm:$0xff]  }
 0x352   : > { %2643 = vmatprep.mubr.bf16.mxu0 %v1162_v38  ;;  %2677 = vmatprep.subr.bf16.mxu0 %v4094_v4  ;;  %v1232_v20 = vpack.c.bf16 %v4083_v55, %v4092_v24 }
 0x353   : > { %v1231_v14 = vpack.c.bf16 %v4080_v25, %v4077_v53  ;;  %2644 = vmatmul.mubr.bf16.gmra.mrb[28].mxu0 %v1163_v48  ;;  %2698 = vmatpush3.bf16.msra.mxu1 %v4038_v19 }
 0x354   : > { %2699 = vmatprep.subr.bf16.mxu1 %v4067_v59 }
 0x355   : > { %2667 = vmatprep.mubr.bf16.mxu1 %v1231_v14  ;;  %2678 = vmatpush3.bf16.msra.mxu0 %v4094_v4 }
 0x356   : > { %2668 = vmatmul.mubr.bf16.gmra.mrb[28].mxu1 %v1232_v20  ;;  %2679 = vmatprep.subr.bf16.mxu0 %v4102_v51 }
 0x357   : > { %2700 = vmatpush3.bf16.msra.mxu1 %v4067_v59 }
 0x358   : > { %2701 = vmatprep.subr.bf16.mxu1 %v4094_v4 }
 0x359   : > { %2680 = vmatpush3.bf16.msra.mxu0 %v4102_v51 }
 0x35a   : > { %2681 = vmatprep.subr.bf16.mxu0 %v4108_v36 }
 0x35b   : > { %2702 = vmatpush3.bf16.msra.mxu1 %v4094_v4 }
 0x35c   : > { %2703 = vmatprep.subr.bf16.mxu1 %v4102_v51 }
 0x35d   : > { %2682 = vmatpush3.bf16.msra.mxu0 %v4108_v36 }
 0x35e   : > { %2683 = vmatprep.subr.bf16.mxu0 %v4114_v21 }
 0x35f   : > { %2704 = vmatpush3.bf16.msra.mxu1 %v4102_v51 }
 0x360   : > { %2705 = vmatprep.subr.bf16.mxu1 %v4108_v36 }
 0x361   : > { %2684 = vmatpush3.bf16.msra.mxu0 %v4114_v21 }
 0x362   : > { %2685 = vmatprep.subr.bf16.mxu0 %v4120_v26 }
 0x363   : > { %2706 = vmatpush3.bf16.msra.mxu1 %v4108_v36 }
 0x364   : > { %2707 = vmatprep.subr.bf16.mxu1 %v4114_v21 }
 0x365   : > { %2686 = vmatpush3.bf16.msra.mxu0 %v4120_v26 }
 0x366   : > { %2719 = vmatprep.subr.bf16.mxu0 %v4028_v60 }
 0x367   : > { %2708 = vmatpush3.bf16.msra.mxu1 %v4114_v21 }
 0x368   : > { %2709 = vmatprep.subr.bf16.mxu1 %v4120_v26 }
 0x36b   : > { %2710 = vmatpush3.bf16.msra.mxu1 %v4120_v26 }
 0x36c   : > { %2743 = vmatprep.subr.bf16.mxu1 %v4028_v60 }
 0x41b   : > { %v2641_v61 = vpop.f32.mrb[24].mxu0 }
 0x41c   : > { %v1300_v28 = vmul.f32 0.05, %v2641_v61  ;;  %v1198_v56 = vpop.f32.mrb[25].mxu0 }
 0x41d   : > { %v1298_v31 = vmul.f32 0.05, %v1198_v56  ;;  %v2642_v35 = vpop.f32.mrb[26].mxu0 }
 0x41e   : > { %v4132_v49 = vsub.f32 %v3956_v57, %v1300_v28  ;;  %v1301_v58 = vmul.f32 0.05, %v2642_v35  ;;  %v1201_v12 = vpop.f32.mrb[27].mxu0 }
 0x41f   : > { %v4135_v2 = vsub.f32 %v3959_v22, %v1298_v31  ;;  %v1299_v15 = vmul.f32 0.05, %v1201_v12 }
 0x420   : > { %v4138_v3 = vsub.f32 %v3963_v27, %v1301_v58  ;;  %v1332_v9 = vmul.f32 0.05, %v4132_v49 }
 0x421   : > { %v2665_v10 = vpop.f32.mrb[24].mxu1  ;;  %v1330_v42 = vmul.f32 0.05, %v4135_v2  ;;  %v4143_v45 = vsub.f32 %v3967_v32, %v1299_v15 }
 0x422   : > { %v1316_v38 = vmul.f32 0.05, %v2665_v10  ;;  %v1267_v57 = vpop.f32.mrb[25].mxu1  ;;  %v1333_v48 = vmul.f32 0.05, %v4138_v3  ;;  %v4163_v12 = vadd.f32 %v1332_v9, %v3991_v1 }
 0x423   : > { %v1314_v14 = vmul.f32 0.05, %v1267_v57  ;;  %v2666_v20 = vpop.f32.mrb[26].mxu1  ;;  %v1331_v22 = vmul.f32 0.05, %v4143_v45  ;;  %v4157_v35 = vadd.f32 %v1330_v42, %v3985_v50 }
 0x424   : > { %v4148_v61 = vsub.f32 %v3971_v41, %v1316_v38  ;;  %v4151_v27 = vadd.f32 %v1333_v48, %v3978_v40  ;;  %v1317_v28 = vmul.f32 0.05, %v2666_v20  ;;  %v1270_v56 = vpop.f32.mrb[27].mxu1 }
 0x425   : > { %v4154_v31 = vsub.f32 %v3975_v11, %v1314_v14  ;;  %v1315_v32 = vmul.f32 0.05, %v1270_v56  ;;  %v4160_v58 = vadd.f32 %v1331_v22, %v3988_v13 }
 0x426   : > { %v1348_v41 = vmul.f32 0.05, %v4148_v61  ;;  %v4167_v40 = vsub.f32 %v3982_v8, %v1317_v28  ;;  %v2645_v15 = vpop.f32.mrb[28].mxu0  ;;  %v1363_v1 = vpack.c.bf16 %v4151_v27, %v4163_v12 }
 0x427   : > { %v1346_v10 = vmul.f32 0.05, %v4154_v31  ;;  %v4171_v11 = vsub.f32 %v3995_v54, %v1315_v32  ;;  %v1304_v38 = vmul.f32 0.05, %v2645_v15  ;;  %v1214_v50 = vpop.f32.mrb[29].mxu0  ;;  %v1362_v13 = vpack.c.bf16 %v4160_v58, %v4157_v35 }
 0x428   : > { %v1349_v9 = vmul.f32 0.05, %v4167_v40  ;;  %v1302_v42 = vmul.f32 0.05, %v1214_v50  ;;  %v2646_v57 = vpop.f32.mrb[30].mxu0  ;;  %v4179_v8 = vadd.f32 %v1348_v41, %v4001_v18 }
 0x429   : > { %v1347_v48 = vmul.f32 0.05, %v4171_v11  ;;  %v2669_v14 = vpop.f32.mrb[28].mxu1  ;;  %v1305_v54 = vmul.f32 0.05, %v2646_v57  ;;  %v1217_v20 = vpop.f32.mrb[31].mxu0  ;;  %2687 = vmatprep.mubr.bf16.mxu0 %v1362_v13  ;;  %v4183_v22 = vsub.f32 %v4007_v46, %v1304_v38 }
 0x42a   : > { %v1320_v28 = vmul.f32 0.05, %v2669_v14  ;;  %v4186_v56 = vsub.f32 %v4010_v0, %v1302_v42  ;;  %v1283_v32 = vpop.f32.mrb[29].mxu1  ;;  %v1303_v15 = vmul.f32 0.05, %v1217_v20  ;;  %2688 = vmatmul.mubr.bf16.vlgmr.msra.gmra.mrb[32].mxu0 %v1363_v1  ;;  %v4189_v50 = vadd.f32 %v1349_v9, %v4013_v30 }
 0x42b   : > { %v1318_v18 = vmul.f32 0.05, %v1283_v32  ;;  %v4192_v41 = vsub.f32 %v4016_v37, %v1305_v54  ;;  %v2670_v57 = vpop.f32.mrb[30].mxu1  ;;  %v4195_v13 = vadd.f32 %v1347_v48, %v4019_v52  ;;  %2720 = vmatpush3.bf16.msra.mxu0 %v4028_v60  ;;  %v4203_v30 = vadd.f32 %v1346_v10, %v4026_v5 }
 0x42c   : > { %v4199_v46 = vsub.f32 %v4022_v7, %v1320_v28  ;;  %v1334_v0 = vmul.f32 0.05, %v4186_v56  ;;  %v1321_v38 = vmul.f32 0.05, %v2670_v57  ;;  %v1286_v1 = vpop.f32.mrb[31].mxu1  ;;  %2721 = vmatprep.subr.bf16.mxu0 %v4038_v19  ;;  %v4211_v9 = vsub.f32 %v4036_v44, %v1303_v15 }
 0x42d   : > { %v4207_v37 = vsub.f32 %v4032_v62, %v1318_v18  ;;  %v1337_v52 = vmul.f32 0.05, %v4192_v41  ;;  %v1319_v42 = vmul.f32 0.05, %v1286_v1  ;;  %v1336_v7 = vmul.f32 0.05, %v4183_v22 }
 0x42e   : > { %v4215_v48 = vsub.f32 %v4043_v63, %v1321_v38  ;;  %v1431_v5 = vpack.c.bf16 %v4195_v13, %v4203_v30  ;;  %v1432_v10 = vpack.c.bf16 %v4189_v50, %v4179_v8  ;;  %v1335_v14 = vmul.f32 0.05, %v4211_v9 }
 0x42f   : > { %v1350_v62 = vmul.f32 0.05, %v4207_v37  ;;  %v4224_v54 = vsub.f32 %v4052_v29, %v1319_v42  ;;  %2722 = vmatpush3.bf16.msra.mxu0 %v4038_v19  ;;  %v4229_v63 = vadd.f32 %v1337_v52, %v4056_v17  ;;  %v1352_v20 = vmul.f32 0.05, %v4199_v46 }
 0x430   : > { %v1353_v44 = vmul.f32 0.05, %v4215_v48  ;;  %2711 = vmatprep.mubr.bf16.mxu1 %v1431_v5  ;;  %2723 = vmatprep.subr.bf16.mxu0 %v4067_v59  ;;  %v4235_v32 = vadd.f32 %v1334_v0, %v4062_v47  ;;  %v4238_v29 = vadd.f32 %v1335_v14, %v4065_v23  ;;  %v4244_v18 = vadd.f32 %v1336_v7, %v4071_v16 }
 0x431   : > { %v1351_v28 = vmul.f32 0.05, %v4224_v54  ;;  %2712 = vmatmul.mubr.bf16.vlgmr.msra.gmra.mrb[32].mxu1 %v1432_v10  ;;  %v4241_v15 = vadd.f32 %v1350_v62, %v4077_v53  ;;  %v4263_v16 = vadd.f32 %v1352_v20, %v4092_v24 }
 0x432   : > { %2744 = vmatpush3.bf16.msra.mxu1 %v4028_v60  ;;  %v1364_v17 = vpack.c.bf16 %v4238_v29, %v4235_v32  ;;  %v4253_v47 = vadd.f32 %v1353_v44, %v4083_v55  ;;  %v1365_v23 = vpack.c.bf16 %v4229_v63, %v4244_v18 }
 0x433   : > { %v4250_v57 = vadd.f32 %v1351_v28, %v4080_v25  ;;  %2745 = vmatprep.subr.bf16.mxu1 %v4038_v19  ;;  %2724 = vmatpush3.bf16.msra.mxu0 %v4067_v59 }
 0x434   : > { %2725 = vmatprep.subr.bf16.mxu0 %v4094_v4  ;;  %2691 = vmatprep.mubr.bf16.mxu0 %v1364_v17  ;;  %v1434_v53 = vpack.c.bf16 %v4253_v47, %v4263_v16 }
 0x435   : > { %v1433_v60 = vpack.c.bf16 %v4250_v57, %v4241_v15  ;;  %2692 = vmatmul.mubr.bf16.gmra.mrb[36].mxu0 %v1365_v23 }
 0x436   : > { %2746 = vmatpush3.bf16.msra.mxu1 %v4038_v19 }
 0x437   : > { %2715 = vmatprep.mubr.bf16.mxu1 %v1433_v60  ;;  %2747 = vmatprep.subr.bf16.mxu1 %v4067_v59 }
 0x438   : > { %2726 = vmatpush3.bf16.msra.mxu0 %v4094_v4 }
 0x439   : > { %2716 = vmatmul.mubr.bf16.gmra.mrb[36].mxu1 %v1434_v53  ;;  %2727 = vmatprep.subr.bf16.mxu0 %v4102_v51 }
 0x43a   : > { %2748 = vmatpush3.bf16.msra.mxu1 %v4067_v59 }
 0x43b   : > { %2749 = vmatprep.subr.bf16.mxu1 %v4094_v4 }
 0x43c   : > { %2728 = vmatpush3.bf16.msra.mxu0 %v4102_v51 }
 0x43d   : > { %2729 = vmatprep.subr.bf16.mxu0 %v4108_v36 }
 0x43e   : > { %2750 = vmatpush3.bf16.msra.mxu1 %v4094_v4 }
 0x43f   : > { %2751 = vmatprep.subr.bf16.mxu1 %v4102_v51 }
 0x440   : > { %2730 = vmatpush3.bf16.msra.mxu0 %v4108_v36 }
 0x441   : > { %2731 = vmatprep.subr.bf16.mxu0 %v4114_v21 }
 0x442   : > { %2752 = vmatpush3.bf16.msra.mxu1 %v4102_v51 }
 0x443   : > { %2753 = vmatprep.subr.bf16.mxu1 %v4108_v36 }
 0x444   : > { %2732 = vmatpush3.bf16.msra.mxu0 %v4114_v21 }
 0x445   : > { %2733 = vmatprep.subr.bf16.mxu0 %v4120_v26 }
 0x446   : > { %2754 = vmatpush3.bf16.msra.mxu1 %v4108_v36 }
 0x447   : > { %2755 = vmatprep.subr.bf16.mxu1 %v4114_v21 }
 0x448   : > { %2734 = vmatpush3.bf16.msra.mxu0 %v4120_v26 }
 0x44a   : > { %2756 = vmatpush3.bf16.msra.mxu1 %v4114_v21 }
 0x44b   : > { %2757 = vmatprep.subr.bf16.mxu1 %v4120_v26 }
 0x44e   : > { %2758 = vmatpush3.bf16.msra.mxu1 %v4120_v26 }
 0x4fd   : > { %v2689_v19 = vpop.f32.mrb[32].mxu0 }
 0x4fe   : > { %v1502_v59 = vmul.f32 0.05, %v2689_v19  ;;  %v1400_v25 = vpop.f32.mrb[33].mxu0 }
 0x4ff   : > { %v1500_v55 = vmul.f32 0.05, %v1400_v25  ;;  %v2690_v24 = vpop.f32.mrb[34].mxu0 }
 0x500   : > { %v4290_v4 = vsub.f32 %v4132_v49, %v1502_v59  ;;  %v1503_v51 = vmul.f32 0.05, %v2690_v24  ;;  %v1403_v36 = vpop.f32.mrb[35].mxu0 }
 0x501   : > { %v4293_v0 = vsub.f32 %v4135_v2, %v1500_v55  ;;  %v1501_v38 = vmul.f32 0.05, %v1403_v36 }
 0x502   : > { %v4296_v21 = vsub.f32 %v4138_v3, %v1503_v51  ;;  %v1534_v52 = vmul.f32 0.05, %v4290_v4 }
 0x503   : > { %v1532_v1 = vmul.f32 0.05, %v4293_v0  ;;  %v4300_v26 = vsub.f32 %v4143_v45, %v1501_v38 }
 0x504   : > { %v2713_v42 = vpop.f32.mrb[32].mxu1  ;;  %v1535_v49 = vmul.f32 0.05, %v4296_v21  ;;  %v4318_v17 = vadd.f32 %v1534_v52, %v4163_v12 }
 0x505   : > { %v1518_v7 = vmul.f32 0.05, %v2713_v42  ;;  %v1469_v5 = vpop.f32.mrb[33].mxu1  ;;  %v1533_v10 = vmul.f32 0.05, %v4300_v26  ;;  %v4312_v45 = vadd.f32 %v1532_v1, %v4157_v35 }
 0x506   : > { %v1516_v2 = vmul.f32 0.05, %v1469_v5  ;;  %v4306_v62 = vadd.f32 %v1535_v49, %v4151_v27  ;;  %v2714_v3 = vpop.f32.mrb[34].mxu1 }
 0x507   : > { %v4309_v14 = vsub.f32 %v4148_v61, %v1518_v7  ;;  %v1519_v44 = vmul.f32 0.05, %v2714_v3  ;;  %v4315_v20 = vadd.f32 %v1533_v10, %v4160_v58  ;;  %v1472_v28 = vpop.f32.mrb[35].mxu1 }
 0x508   : > { %v4321_v23 = vsub.f32 %v4154_v31, %v1516_v2  ;;  %v1517_v27 = vmul.f32 0.05, %v1472_v28  ;;  %v2693_v53 = vpop.f32.mrb[36].mxu0  ;;  %v1565_v19 = vpack.c.bf16 %v4306_v62, %v4318_v17 }
 0x509   : > { %v1550_v60 = vmul.f32 0.05, %v4309_v14  ;;  %v4325_v61 = vsub.f32 %v4167_v40, %v1519_v44  ;;  %v1564_v35 = vpack.c.bf16 %v4315_v20, %v4312_v45  ;;  %v1506_v31 = vmul.f32 0.05, %v2693_v53  ;;  %v1416_v59 = vpop.f32.mrb[37].mxu0 }
 0x50a   : > { %v1548_v58 = vmul.f32 0.05, %v4321_v23  ;;  %v4333_v12 = vsub.f32 %v4171_v11, %v1517_v27  ;;  %v1504_v55 = vmul.f32 0.05, %v1416_v59  ;;  %v2694_v24 = vpop.f32.mrb[38].mxu0 }
 0x50b   : > { %v1551_v25 = vmul.f32 0.05, %v4325_v61  ;;  %2735 = vmatprep.mubr.bf16.mxu0 %v1564_v35  ;;  %v1507_v36 = vmul.f32 0.05, %v2694_v24  ;;  %v1419_v38 = vpop.f32.mrb[39].mxu0  ;;  %v4338_v1 = vsub.f32 %v4183_v22, %v1506_v31  ;;  %v4353_v22 = vadd.f32 %v1550_v60, %v4179_v8 }
 0x50c   : > { %v1549_v40 = vmul.f32 0.05, %v4333_v12  ;;  %v2717_v51 = vpop.f32.mrb[36].mxu1  ;;  %2736 = vmatmul.mubr.bf16.vlgmr.msra.gmra.mrb[40].mxu0 %v1565_v19  ;;  %v4341_v11 = vsub.f32 %v4186_v56, %v1504_v55  ;;  %v1505_v49 = vmul.f32 0.05, %v1419_v38  ;;  %v4356_v44 = vadd.f32 %v1548_v58, %v4203_v30 }
 0x50d   : > { %v1522_v52 = vmul.f32 0.05, %v2717_v51  ;;  %v1485_v42 = vpop.f32.mrb[37].mxu1  ;;  %v4344_v7 = vadd.f32 %v1551_v25, %v4189_v50  ;;  %v4350_v2 = vsub.f32 %v4192_v41, %v1507_v36  ;;  %v1538_v41 = vmul.f32 0.05, %v4338_v1 }
 0x50e   : > { %v4347_v5 = vadd.f32 %v1549_v40, %v4195_v13  ;;  %v1520_v10 = vmul.f32 0.05, %v1485_v42  ;;  %v2718_v3 = vpop.f32.mrb[38].mxu1  ;;  %v1536_v27 = vmul.f32 0.05, %v4341_v11  ;;  %v4364_v53 = vsub.f32 %v4211_v9, %v1505_v49 }
 0x50f   : > { %v1523_v56 = vmul.f32 0.05, %v2718_v3  ;;  %v1488_v28 = vpop.f32.mrb[39].mxu1  ;;  %v1539_v13 = vmul.f32 0.05, %v4350_v2  ;;  %v4368_v8 = vsub.f32 %v4199_v46, %v1522_v52  ;;  %v1634_v35 = vpack.c.bf16 %v4344_v7, %v4353_v22 }
 0x510   : > { %4831 = vst [vmem:[#allocation18_spill] sm:$0xff] %v4347_v5  ;;  %v4360_v50 = vsub.f32 %v4207_v37, %v1520_v10  ;;  %v1521_v60 = vmul.f32 0.05, %v1488_v28  ;;  %v1537_v37 = vmul.f32 0.05, %v4364_v53  ;;  %v1633_v58 = vpack.c.bf16 %v4347_v5, %v4356_v44 }
 0x511   : > { %v4371_v30 = vsub.f32 %v4215_v48, %v1523_v56  ;;  %v4380_v19 = vadd.f32 %v1539_v13, %v4229_v63  ;;  %v4387_v48 = vadd.f32 %v1536_v27, %v4235_v32  ;;  %v4393_v25 = vadd.f32 %v1538_v41, %v4244_v18 }
 0x512   : > { %v1552_v9 = vmul.f32 0.05, %v4360_v50  ;;  %v4384_v31 = vsub.f32 %v4224_v54, %v1521_v60  ;;  %v4390_v59 = vadd.f32 %v1537_v37, %v4238_v29  ;;  %2759 = vmatprep.mubr.bf16.mxu1 %v1633_v58  ;;  %v1554_v55 = vmul.f32 0.05, %v4368_v8 }
 0x513   : > { %v1555_v46 = vmul.f32 0.05, %v4371_v30  ;;  %2760 = vmatmul.mubr.bf16.vlgmr.msra.gmra.mrb[40].mxu1 %v1634_v35  ;;  %v1567_v18 = vpack.c.bf16 %v4380_v19, %v4393_v25 }
 0x514   : > { %v1553_v63 = vmul.f32 0.05, %v4384_v31  ;;  %v1566_v24 = vpack.c.bf16 %v4390_v59, %v4387_v48  ;;  %v4400_v54 = vadd.f32 %v1552_v9, %v4241_v15  ;;  %v4411_v40 = vadd.f32 %v1554_v55, %v4263_v16 }
 0x515   : > { %v4403_v32 = vadd.f32 %v1555_v46, %v4253_v47 }
 0x516   : > { %v4406_v29 = vadd.f32 %v1553_v63, %v4250_v57  ;;  %2739 = vmatprep.mubr.bf16.mxu0 %v1566_v24 }
 0x517   : > { %2740 = vmatmul.mubr.bf16.gmra.mrb[44].mxu0 %v1567_v18  ;;  %v1636_v15 = vpack.c.bf16 %v4403_v32, %v4411_v40 }
 0x518   : > { %v1635_v51 = vpack.c.bf16 %v4406_v29, %v4400_v54 }
 0x51a   : > { %2763 = vmatprep.mubr.bf16.mxu1 %v1635_v51 }
 0x51b   : > { %2764 = vmatmul.mubr.bf16.gmra.mrb[44].mxu1 %v1636_v15 }
 0x5df   : > { %v2737_v47 = vpop.f32.mrb[40].mxu0 }
 0x5e0   : > { %v1602_v36 = vpop.f32.mrb[41].mxu0  ;;  %v1737_v57 = vmul.f32 %v2737_v47, %v4318_v17  ;;  %v1704_v13 = vmul.f32 0.025, %v2737_v47 }
 0x5e1   : > { %v2738_v38 = vpop.f32.mrb[42].mxu0  ;;  %v1735_v60 = vmul.f32 %v1602_v36, %v4312_v45 }
 0x5e2   : > { %1747 = vadd.xlane.f32.xlu0 %v1737_v57  ;;  %v1605_v52 = vpop.f32.mrb[43].mxu0  ;;  %v1738_v42 = vmul.f32 %v2738_v38, %v4306_v62  ;;  %v1705_v37 = vmul.f32 0.025, %v2738_v38  ;;  %v1712_v18 = vsub.f32 %v4290_v4, %v1704_v13 }
 0x5e3   : > { %v1736_v9 = vmul.f32 %v1605_v52, %v4315_v20 }
 0x5e4   : > { %1749 = vadd.xlane.f32.xlu1 %v1738_v42  ;;  %v1713_v38 = vsub.f32 %v4296_v21, %v1705_v37  ;;  %v1702_v42 = vmul.f32 0.025, %v1602_v36 }
 0x5e6   : > { %v2761_v16 = vpop.f32.mrb[40].mxu1 }
 0x5e7   : > { %v1671_v49 = vpop.f32.mrb[41].mxu1  ;;  %v1915_v10 = vmul.f32 %v2761_v16, %v4353_v22  ;;  %v1720_v55 = vmul.f32 0.025, %v2761_v16 }
 0x5e8   : > { %v2762_v3 = vpop.f32.mrb[42].mxu1  ;;  %v1913_v24 = vmul.f32 %v1671_v49, %v4356_v44  ;;  %v1718_v4 = vmul.f32 0.025, %v1671_v49 }
 0x5e9   : > { %v1674_v56 = vpop.f32.mrb[43].mxu1  ;;  %1925 = vadd.xlane.f32.xlu0 %v1915_v10  ;;  %v1916_v28 = vmul.f32 %v2762_v3, %v4344_v7  ;;  %v1721_v15 = vmul.f32 0.025, %v2762_v3  ;;  %v1769_v10 = vmul.f32 %v1712_v18, %v1712_v18  ;;  %v1728_v16 = vsub.f32 %v4309_v14, %v1720_v55 }
 0x5ea   : > { %v2741_v27 = vpop.f32.mrb[44].mxu0  ;;  %v1914_v57 = vmul.f32 %v1674_v56, %v4347_v5  ;;  %v1710_v3 = vsub.f32 %v4293_v0, %v1702_v42  ;;  %v1726_v37 = vsub.f32 %v4321_v23, %v1718_v4 }
 0x5eb   : > { %v1618_v41 = vpop.f32.mrb[45].mxu0  ;;  %1927 = vadd.xlane.f32.xlu1 %v1916_v28  ;;  %v1703_v28 = vmul.f32 0.025, %v1605_v52  ;;  %v1947_v13 = vmul.f32 %v1728_v16, %v1728_v16  ;;  %v1741_v0 = vmul.f32 %v2741_v27, %v4393_v25 }
 0x5ec   : > { %v2742_v35 = vpop.f32.mrb[46].mxu0  ;;  %v1767_v36 = vmul.f32 %v1710_v3, %v1710_v3 }
 0x5ed   : > { %1743 = vadd.xlane.f32.xlu0 %v1735_v60  ;;  %v1621_v58 = vpop.f32.mrb[47].mxu0  ;;  %v1770_v60 = vmul.f32 %v1713_v38, %v1713_v38  ;;  %v1711_v21 = vsub.f32 %v4300_v26, %v1703_v28  ;;  %v1709_v55 = vmul.f32 0.025, %v2742_v35 }
 0x5ee   : > { %v4423_v46 = vpop.f32.mrb[44].mxu1  ;;  %v1740_v18 = vmul.f32 %v1621_v58, %v4390_v59 }
 0x5ef   : > { %v1687_v63 = vpop.f32.mrb[45].mxu1  ;;  %1745 = vadd.xlane.f32.xlu1 %v1736_v9  ;;  %v1729_v9 = vsub.f32 %v4325_v61, %v1721_v15  ;;  %v1768_v14 = vmul.f32 %v1711_v21, %v1711_v21  ;;  %v1945_v61 = vmul.f32 %v1726_v37, %v1726_v37  ;;  %v1919_v26 = vmul.f32 %v4423_v46, %v4411_v40 }
 0x5f0   : > { %v4427_v51 = vpop.f32.mrb[46].mxu1  ;;  %v1706_v15 = vmul.f32 0.025, %v1618_v41  ;;  %v1717_v16 = vsub.f32 %v4350_v2, %v1709_v55  ;;  %v1724_v4 = vmul.f32 0.025, %v4423_v46  ;;  %v590_v55 = vmul.f32 0.5, %v3777_v6 }
 0x5f1   : > { %v1690_v47 = vpop.f32.mrb[47].mxu1  ;;  %1921 = vadd.xlane.f32.xlu0 %v1913_v24  ;;  %v1719_v24 = vmul.f32 0.025, %v1674_v56  ;;  %v1948_v5 = vmul.f32 %v1729_v9, %v1729_v9  ;;  %v1742_v56 = vmul.f32 %v2742_v35, %v4380_v19  ;;  %v1920_v23 = vmul.f32 %v4427_v51, %v4403_v32  ;;  %v4832_v6 = vld [vmem:[#allocation33_spill] sm:$0xff] }
 0x5f2   : > { %v1918_v42 = vmul.f32 %v1690_v47, %v4406_v29  ;;  %v1714_v35 = vsub.f32 %v4341_v11, %v1706_v15  ;;  %v1774_v9 = vmul.f32 %v1717_v16, %v1717_v16  ;;  %v622_v16 = vmul.f32 0.5, %v4832_v6 }
 0x5f3   : > { %1923 = vadd.xlane.f32.xlu1 %v1914_v57  ;;  %v1727_v52 = vsub.f32 %v4333_v12, %v1719_v24  ;;  %v1739_v12 = vmul.f32 %v1618_v41, %v4387_v48  ;;  %v1917_v57 = vmul.f32 %v1687_v63, %v4400_v54 }
 0x5f5   : > { %1779 = vadd.xlane.f32.xlu0 %v1769_v10  ;;  %v1946_v49 = vmul.f32 %v1727_v52, %v1727_v52  ;;  %v1707_v10 = vmul.f32 0.025, %v1621_v58  ;;  %v1725_v58 = vmul.f32 0.025, %v4427_v51  ;;  %v4459_v51 = vpop.xlane.xlu1 %618 }
 0x5f7   : > { %1781 = vadd.xlane.f32.xlu1 %v1770_v60  ;;  %v1723_v60 = vmul.f32 0.025, %v1690_v47  ;;  %v1715_v41 = vsub.f32 %v4364_v53, %v1707_v10  ;;  %v1732_v47 = vsub.f32 %v4368_v8, %v1724_v4  ;;  %v1733_v53 = vsub.f32 %v4371_v30, %v1725_v58  ;;  %v4836_v58 = vld [vmem:[#allocation34_spill] sm:$0xff] }
 0x5f9   : > { %1957 = vadd.xlane.f32.xlu0 %v1947_v13  ;;  %v1772_v2 = vmul.f32 %v1715_v41, %v1715_v41  ;;  %v1951_v46 = vmul.f32 %v1732_v47, %v1732_v47  ;;  %v1952_v24 = vmul.f32 %v1733_v53, %v1733_v53  ;;  %v4464_v21 = vpop.xlane.xlu1 %582 }
 0x5fb   : > { %1959 = vadd.xlane.f32.xlu1 %v1948_v5  ;;  %v1708_v5 = vmul.f32 0.025, %v2741_v27  ;;  %v1722_v27 = vmul.f32 0.025, %v1687_v63  ;;  %v1731_v63 = vsub.f32 %v4384_v31, %v1723_v60  ;;  %v4834_v60 = vld [vmem:[#allocation36_spill] sm:$0xff] }
 0x5fd   : > { %1775 = vadd.xlane.f32.xlu0 %v1767_v36  ;;  %v1716_v38 = vsub.f32 %v4338_v1, %v1708_v5  ;;  %v1771_v1 = vmul.f32 %v1714_v35, %v1714_v35  ;;  %v1730_v13 = vsub.f32 %v4360_v50, %v1722_v27  ;;  %v1950_v3 = vmul.f32 %v1731_v63, %v1731_v63  ;;  %v4457_v50 = vpop.xlane.xlu0 %616  ;;  %v4471_v30 = vpop.xlane.xlu1 %614  ;;  %v4833_v35 = vld [vmem:[#allocation28_spill] sm:$0xff] }
 0x5ff   : > { %1777 = vadd.xlane.f32.xlu1 %v1768_v14  ;;  %v1773_v28 = vmul.f32 %v1716_v38, %v1716_v38  ;;  %v1949_v11 = vmul.f32 %v1730_v13, %v1730_v13  ;;  %v591_v38 = vmul.f32 0.5, %v3781_v34  ;;  %v623_v34 = vmul.f32 0.5, %v4834_v60  ;;  %v4842_v60 = vld [vmem:[#allocation37_spill] sm:$0xff] }
 0x601   : > { %1953 = vadd.xlane.f32.xlu0 %v1945_v61  ;;  %v4462_v31 = vpop.xlane.xlu0 %580 }
 0x603   : > { %1955 = vadd.xlane.f32.xlu1 %v1946_v49 }
 0x605   : > { %1755 = vadd.xlane.f32.xlu0 %v1741_v0  ;;  %v4468_v8 = vpop.xlane.xlu0 %612 }
 0x607   : > { %1757 = vadd.xlane.f32.xlu1 %v1742_v56 }
 0x609   : > { %1933 = vadd.xlane.f32.xlu0 %v1919_v26 }
 0x60b   : > { %1935 = vadd.xlane.f32.xlu1 %v1920_v23 }
 0x60d   : > { %1751 = vadd.xlane.f32.xlu0 %v1739_v12  ;;  %v654_v12 = vmul.f32 0.5, %v3751_v39  ;;  %v686_v39 = vmul.f32 0.5, %v3763_v43  ;;  %v4835_v43 = vld [vmem:[#allocation22_spill] sm:$0xff] }
 0x60e   : > { %v652_v13 = vmul.f32 0.5, %v4835_v43 }
 0x60f   : > { %1753 = vadd.xlane.f32.xlu1 %v1740_v18  ;;  %v1801_v27 = vadd.f32 %v654_v12, %v590_v55  ;;  %v4839_v55 = vld [vmem:[#allocation26_spill] sm:$0xff] }
 0x611   : > { %1929 = vadd.xlane.f32.xlu0 %v1917_v57  ;;  %v655_v57 = vmul.f32 0.5, %v3753_v33  ;;  %v687_v33 = vmul.f32 0.5, %v4833_v35  ;;  %v4841_v35 = vld [vmem:[#allocation27_spill] sm:$0xff] }
 0x613   : > { %1931 = vadd.xlane.f32.xlu1 %v1918_v42  ;;  %v1802_v41 = vadd.f32 %v655_v57, %v591_v38  ;;  %v4840_v38 = vld [vmem:[#allocation35_spill] sm:$0xff] }
 0x615   : > { %1787 = vadd.xlane.f32.xlu0 %v1773_v28 }
 0x617   : > { %1789 = vadd.xlane.f32.xlu1 %v1774_v9 }
 0x619   : > { %1783 = vadd.xlane.f32.xlu0 %v1771_v1 }
 0x61b   : > { %1785 = vadd.xlane.f32.xlu1 %v1772_v2  ;;  %v588_v2 = vmul.f32 0.5, %v4836_v58 }
 0x61d   : > { %1961 = vadd.xlane.f32.xlu0 %v1949_v11  ;;  %v1979_v11 = vadd.f32 %v686_v39, %v622_v16  ;;  %v1799_v57 = vadd.f32 %v652_v13, %v588_v2 }
 0x61f   : > { %1963 = vadd.xlane.f32.xlu1 %v1950_v3 }
 0x621   : > { %1965 = vadd.xlane.f32.xlu0 %v1951_v46  ;;  %v4837_v46 = vld [vmem:[#allocation23_spill] sm:$0xff] }
 0x623   : > { %1967 = vadd.xlane.f32.xlu1 %v1952_v24  ;;  %v653_v24 = vmul.f32 0.5, %v4837_v46 }
 0x66f   : > { %v1748_v36 = vpop.xlane.xlu0 %1747 }
 0x670   : > { %v1761_v37 = vmul.f32 0.5, %v1748_v36  ;;  %v1980_v36 = vadd.f32 %v687_v33, %v623_v34  ;;  %v685_v33 = vmul.f32 0.5, %v4841_v35  ;;  %v621_v34 = vmul.f32 0.5, %v4842_v60 }
 0x671   : > { %v1750_v14 = vpop.xlane.xlu1 %1749  ;;  %v3063_v35 = vmov 0.0  }
 0x672   : > { %1891 = vst.msk [vmem:[%s4478_s12 + $0x10] sm:$0xff] %vm1888_vm0, %v1761_v37  ;;  %v1762_v52 = vmul.f32 0.5, %v1750_v14  ;;  %v1809_v4 = vsub.f32 %v1801_v27, %v1761_v37  ;;  %v4838_v14 = vld [vmem:[#allocation38_spill] sm:$0xff] }
 0x674   : > { %1892 = vst.msk [vmem:[%s4478_s12 + $0x18] sm:$0xff] %vm1888_vm0, %v1762_v52  ;;  %v1810_v47 = vsub.f32 %v1802_v41, %v1762_v52 }
 0x676   : > { %v1926_v61 = vpop.xlane.xlu0 %1925 }
 0x677   : > { %v1939_v49 = vmul.f32 0.5, %v1926_v61  ;;  %v589_v61 = vmul.f32 0.5, %v4838_v14 }
 0x678   : > { %v1928_v0 = vpop.xlane.xlu1 %1927 }
 0x679   : > { %2075 = vst.msk [vmem:[%s4478_s12 + $0x50] sm:$0xff] %vm1888_vm0, %v1939_v49  ;;  %v1940_v56 = vmul.f32 0.5, %v1928_v0  ;;  %v1987_v37 = vsub.f32 %v1979_v11, %v1939_v49 }
 0x67a   : > { %v1744_v26 = vpop.xlane.xlu0 %1743 }
 0x67b   : > { %2076 = vst.msk [vmem:[%s4478_s12 + $0x58] sm:$0xff] %vm1888_vm0, %v1940_v56  ;;  %v4488_v23 = vmul.f32 0.5, %v1744_v26  ;;  %v1988_v6 = vsub.f32 %v1980_v36, %v1940_v56 }
 0x67c   : > { %v1746_v5 = vpop.xlane.xlu1 %1745 }
 0x67d   : > { %1889 = vst.msk [vmem:[%s4478_s12] sm:$0xff] %vm1888_vm0, %v4488_v23  ;;  %v4495_v18 = vmul.f32 0.5, %v1746_v5  ;;  %v1807_v49 = vsub.f32 %v1799_v57, %v4488_v23 }
 0x67e   : > { %v1922_v15 = vpop.xlane.xlu0 %1921 }
 0x67f   : > { %1890 = vst.msk [vmem:[%s4478_s12 + $0x8] sm:$0xff] %vm1888_vm0, %v4495_v18  ;;  %v4502_v42 = vmul.f32 0.5, %v1922_v15  ;;  %v684_v15 = vmul.f32 0.5, %v4839_v55 }
 0x680   : > { %v1924_v10 = vpop.xlane.xlu1 %1923 }
 0x681   : > { %2073 = vst.msk [vmem:[%s4478_s12 + $0x40] sm:$0xff] %vm1888_vm0, %v4502_v42  ;;  %v4509_v28 = vmul.f32 0.5, %v1924_v10  ;;  %v620_v10 = vmul.f32 0.5, %v4840_v38 }
 0x682   : > { %v1780_v9 = vpop.xlane.xlu0 %1779 }
 0x683   : > { %2074 = vst.msk [vmem:[%s4478_s12 + $0x48] sm:$0xff] %vm1888_vm0, %v4509_v28  ;;  %v1793_v1 = vmul.f32 0.5, %v1780_v9  ;;  %v1800_v9 = vadd.f32 %v653_v24, %v589_v61  ;;  %v1977_v13 = vadd.f32 %v684_v15, %v620_v10 }
 0x684   : > { %v1782_v63 = vpop.xlane.xlu1 %1781 }
 0x685   : > { %v1817_v3 = vsub.f32 %v1809_v4, %v1793_v1  ;;  %v1794_v53 = vmul.f32 0.5, %v1782_v63  ;;  %v1808_v56 = vsub.f32 %v1800_v9, %v4495_v18 }
 0x686   : > { %v1958_v0 = vpop.xlane.xlu0 %1957 }
 0x687   : > { %v1827_v26 = vmul.f32 1.442695, %v1817_v3  ;;  %v1818_v5 = vsub.f32 %v1810_v47, %v1794_v53  ;;  %v1971_v12 = vmul.f32 0.5, %v1958_v0  ;;  %v1978_v47 = vadd.f32 %v685_v33, %v621_v34 }
 0x688   : > { %v1960_v39 = vpop.xlane.xlu1 %1959  ;;  %v1985_v3 = vsub.f32 %v1977_v13, %v4502_v42  ;;  %v2036_v13 = vld [vmem:[%s3299_s16 + $0x58] sm:$0xff] }
 0x689   : > { %2844 = vpow2.f32 %v1827_v26  ;;  %v1829_v52 = vmul.f32 1.442695, %v1818_v5  ;;  %v1995_v16 = vsub.f32 %v1987_v37, %v1971_v12  ;;  %v1972_v27 = vmul.f32 0.5, %v1960_v39 }
 0x68a   : > { %v1776_v41 = vpop.xlane.xlu0 %1775  ;;  %v1986_v36 = vsub.f32 %v1978_v47, %v4509_v28  ;;  %v4528_v37 = vstv %s1734_s20 }
 0x68b   : > { %2846 = vpow2.f32 %v1829_v52  ;;  %v2005_v4 = vmul.f32 1.442695, %v1995_v16  ;;  %v1996_v1 = vsub.f32 %v1988_v6, %v1972_v27  ;;  %v1791_v43 = vmul.f32 0.5, %v1776_v41  ;;  %v2884_v16 = vld [vmem:[%s3299_s16 + $0x10] sm:$0xff]  ;;  %v2885_v41 = vld [vmem:[%s3299_s16 + $0x18] sm:$0xff] }
 0x68c   : > { %v1778_v58 = vpop.xlane.xlu1 %1777 }
 0x68d   : > { %2848 = vpow2.f32 %v2005_v4  ;;  %v2007_v2 = vmul.f32 1.442695, %v1996_v1  ;;  %v1815_v63 = vsub.f32 %v1807_v49, %v1791_v43  ;;  %v1792_v11 = vmul.f32 0.5, %v1778_v58 }
 0x68e   : > { %v1954_v53 = vpop.xlane.xlu0 %1953 }
 0x68f   : > { %2850 = vpow2.f32 %v2007_v2  ;;  %v1823_v23 = vmul.f32 1.442695, %v1815_v63  ;;  %v1816_v46 = vsub.f32 %v1808_v56, %v1792_v11  ;;  %v1969_v24 = vmul.f32 0.5, %v1954_v53 }
 0x690   : > { %v1956_v14 = vpop.xlane.xlu1 %1955 }
 0x691   : > { %2852 = vpow2.f32 %v1823_v23  ;;  %v1825_v61 = vmul.f32 1.442695, %v1816_v46  ;;  %v1993_v18 = vsub.f32 %v1985_v3, %v1969_v24  ;;  %v1970_v0 = vmul.f32 0.5, %v1956_v14 }
 0x692   : > { %v1756_v26 = vpop.xlane.xlu0 %1755 }
 0x693   : > { %v2845_v5 = vpop.eup %2844  ;;  %2854 = vpow2.f32 %v1825_v61  ;;  %v2001_v42 = vmul.f32 1.442695, %v1993_v18  ;;  %v1994_v12 = vsub.f32 %v1986_v36, %v1970_v0  ;;  %v4530_v55 = vmul.f32 0.5, %v1756_v26  ;;  %v4843_v26 = vld [vmem:[#allocation24_spill] sm:$0xff] }
 0x694   : > { %v1841_v15 = vmin.f32 %v2845_v5, 1.0  ;;  %v1758_v57 = vpop.xlane.xlu1 %1757  ;;  %v656_v5 = vmul.f32 0.5, %v4843_v26 }
 0x695   : > { %v2847_v28 = vpop.eup %2846  ;;  %2856 = vpow2.f32 %v2001_v42  ;;  %v2003_v38 = vmul.f32 1.442695, %v1994_v12  ;;  %1895 = vst.msk [vmem:[%s4478_s12 + $0x30] sm:$0xff] %vm1888_vm0, %v4530_v55  ;;  %v4542_v10 = vmul.f32 0.5, %v1758_v57  ;;  %v592_v42 = vmul.f32 0.5, %v4462_v31 }
 0x696   : > { %vm1850_vm1 = vcmp.lt.f32.partialorder %v4528_v37, %v1841_v15  ;;  %v1842_v6 = vmin.f32 %v2847_v28, 1.0  ;;  %v1934_v39 = vpop.xlane.xlu0 %1933  ;;  %v4844_v28 = vld [vmem:[#allocation25_spill] sm:$0xff] }
 0x697   : > { %v2849_v52 = vpop.eup %2848  ;;  %v1874_v27 = vsel %vm1850_vm1, %v4318_v17, %v2884_v16  ;;  %v2313_v33 = vsel %vm1850_vm1, 1.0, %v3063_v35  ;;  %2858 = vpow2.f32 %v2003_v38  ;;  %1896 = vst.msk [vmem:[%s4478_s12 + $0x38] sm:$0xff] %vm1888_vm0, %v4542_v10  ;;  %v2035_v17 = vld [vmem:[%s3299_s16 + $0x50] sm:$0xff]  ;;  %v4559_v34 = vmul.f32 0.5, %v1934_v39 }
 0x698   : > { %1882 = vst [vmem:[%s4552_s11 + $0x10] sm:$0xff] %v1874_v27  ;;  %1907 = vst.msk [vmem:[%s4537_s18 + $0x10] sm:$0xff] %vm1888_vm0, %v2313_v33  ;;  %vm1851_vm2 = vcmp.lt.f32.partialorder %v4528_v37, %v1842_v6  ;;  %v2019_v60 = vmin.f32 %v2849_v52, 1.0  ;;  %v1936_v9 = vpop.xlane.xlu1 %1935  ;;  %v657_v38 = vmul.f32 0.5, %v4844_v28  ;;  %v2887_v6 = vld [vmem:[%s3299_s16 + $0x8] sm:$0xff]  ;;  %v4845_v16 = vld [vmem:[#allocation29_spill] sm:$0xff] }
 0x699   : > { %v2851_v49 = vpop.eup %2850  ;;  %v1875_v4 = vsel %vm1851_vm2, %v4306_v62, %v2885_v41  ;;  %v2314_v1 = vsel %vm1851_vm2, 1.0, %v3063_v35  ;;  %v4564_v43 = vmul.f32 0.5, %v1936_v9  ;;  %2079 = vst.msk [vmem:[%s4478_s12 + $0x70] sm:$0xff] %vm1888_vm0, %v4559_v34  ;;  %v688_v27 = vmul.f32 0.5, %v4845_v16  ;;  %v4846_v41 = vld [vmem:[#allocation39_spill] sm:$0xff] }
 0x69a   : > { %1883 = vst [vmem:[%s4552_s11 + $0x18] sm:$0xff] %v1875_v4  ;;  %1908 = vst.msk [vmem:[%s4537_s18 + $0x18] sm:$0xff] %vm1888_vm0, %v2314_v1  ;;  %vm2027_vm3 = vcmp.lt.f32.partialorder %v4528_v37, %v2019_v60  ;;  %v2020_v56 = vmin.f32 %v2851_v49, 1.0  ;;  %v1752_v58 = vpop.xlane.xlu0 %1751  ;;  %v593_v33 = vmul.f32 0.5, %v4464_v21  ;;  %v1813_v4 = vsub.f32 %v4846_v41, %v4530_v55 }
 0x69b   : > { %v2853_v2 = vpop.eup %2852  ;;  %v2059_v62 = vsel %vm2027_vm3, %v4353_v22, %v2035_v17  ;;  %v2321_v63 = vsel %vm2027_vm3, 1.0, %v3063_v35  ;;  %2080 = vst.msk [vmem:[%s4478_s12 + $0x78] sm:$0xff] %vm1888_vm0, %v4564_v43  ;;  %v4579_v11 = vmul.f32 0.5, %v1752_v58  ;;  %v2034_v17 = vld [vmem:[%s3299_s16 + $0x48] sm:$0xff]  ;;  %v1803_v1 = vadd.f32 %v656_v5, %v592_v42 }
 0x69c   : > { %2067 = vst [vmem:[%s4552_s11 + $0x50] sm:$0xff] %v2059_v62  ;;  %2091 = vst.msk [vmem:[%s4537_s18 + $0x50] sm:$0xff] %vm1888_vm0, %v2321_v63  ;;  %vm2028_vm4 = vcmp.lt.f32.partialorder %v4528_v37, %v2020_v56  ;;  %v1839_v47 = vmin.f32 %v2853_v2, 1.0  ;;  %v1754_v3 = vpop.xlane.xlu1 %1753  ;;  %v4848_v2 = vld [vmem:[#allocation18_spill] sm:$0xff]  ;;  %v627_v28 = vmul.f32 0.5, %v4459_v51 }
 0x69d   : > { %v2855_v53 = vpop.eup %2854  ;;  %v2060_v23 = vsel %vm2028_vm4, %v4344_v7, %v2036_v13  ;;  %v2322_v22 = vsel %vm2028_vm4, 1.0, %v3063_v35  ;;  %1893 = vst.msk [vmem:[%s4478_s12 + $0x20] sm:$0xff] %vm1888_vm0, %v4579_v11  ;;  %v4590_v46 = vmul.f32 0.5, %v1754_v3  ;;  %v2886_v7 = vld [vmem:[%s3299_s16] sm:$0xff]  ;;  %v624_v13 = vmul.f32 0.5, %v4468_v8  ;;  %v4849_v3 = vld [vmem:[#allocation30_spill] sm:$0xff] }
 0x69e   : > { %2068 = vst [vmem:[%s4552_s11 + $0x58] sm:$0xff] %v2060_v23  ;;  %2092 = vst.msk [vmem:[%s4537_s18 + $0x58] sm:$0xff] %vm1888_vm0, %v2322_v22  ;;  %vm1848_vm5 = vcmp.lt.f32.partialorder %v4528_v37, %v1839_v47  ;;  %v1840_v24 = vmin.f32 %v2855_v53, 1.0  ;;  %v1930_v36 = vpop.xlane.xlu0 %1929  ;;  %v689_v53 = vmul.f32 0.5, %v4849_v3  ;;  %v1804_v23 = vadd.f32 %v657_v38, %v593_v33 }
 0x69f   : > { %v2857_v14 = vpop.eup %2856  ;;  %v1872_v61 = vsel %vm1848_vm5, %v4312_v45, %v2886_v7  ;;  %v2311_v18 = vsel %vm1848_vm5, 1.0, %v3063_v35  ;;  %1894 = vst.msk [vmem:[%s4478_s12 + $0x28] sm:$0xff] %vm1888_vm0, %v4590_v46  ;;  %v4602_v0 = vmul.f32 0.5, %v1930_v36  ;;  %v2033_v45 = vld [vmem:[%s3299_s16 + $0x40] sm:$0xff]  ;;  %v625_v8 = vmul.f32 0.5, %v4471_v30 }
 0x6a0   : > { %1880 = vst [vmem:[%s4552_s11] sm:$0xff] %v1872_v61  ;;  %1905 = vst.msk [vmem:[%s4537_s18] sm:$0xff] %vm1888_vm0, %v2311_v18  ;;  %vm1849_vm6 = vcmp.lt.f32.partialorder %v4528_v37, %v1840_v24  ;;  %v2017_v12 = vmin.f32 %v2857_v14, 1.0  ;;  %v1932_v15 = vpop.xlane.xlu1 %1931  ;;  %v1811_v24 = vsub.f32 %v1803_v1, %v4579_v11  ;;  %v4850_v7 = vld [vmem:[#allocation31_spill] sm:$0xff]  ;;  %v626_v18 = vmul.f32 0.5, %v4457_v50 }
 0x6a1   : > { %v2859_v57 = vpop.eup %2858  ;;  %v1873_v39 = vsel %vm1849_vm6, %v4315_v20, %v2887_v6  ;;  %v2312_v31 = vsel %vm1849_vm6, 1.0, %v3063_v35  ;;  %2077 = vst.msk [vmem:[%s4478_s12 + $0x60] sm:$0xff] %vm1888_vm0, %v4602_v0  ;;  %v4618_v52 = vmul.f32 0.5, %v1932_v15  ;;  %v690_v61 = vmul.f32 0.5, %v4850_v7  ;;  %v4851_v15 = vld [vmem:[#allocation32_spill] sm:$0xff] }
 0x6a2   : > { %1881 = vst [vmem:[%s4552_s11 + $0x8] sm:$0xff] %v1873_v39  ;;  %1906 = vst.msk [vmem:[%s4537_s18 + $0x8] sm:$0xff] %vm1888_vm0, %v2312_v31  ;;  %vm2025_vm7 = vcmp.lt.f32.partialorder %v4528_v37, %v2017_v12  ;;  %v2018_v20 = vmin.f32 %v2859_v57, 1.0  ;;  %v1788_v60 = vpop.xlane.xlu0 %1787  ;;  %v1981_v26 = vadd.f32 %v688_v27, %v624_v13  ;;  %v1812_v5 = vsub.f32 %v1804_v23, %v4590_v46 }
 0x6a3   : > { %v2057_v9 = vsel %vm2025_vm7, %v4356_v44, %v2033_v45  ;;  %v2319_v49 = vsel %vm2025_vm7, 1.0, %v3063_v35  ;;  %2078 = vst.msk [vmem:[%s4478_s12 + $0x68] sm:$0xff] %vm1888_vm0, %v4618_v52  ;;  %v1797_v21 = vmul.f32 0.5, %v1788_v60  ;;  %v4847_v44 = vld [vmem:[#allocation40_spill] sm:$0xff]  ;;  %v691_v57 = vmul.f32 0.5, %v4851_v15 }
 0x6a4   : > { %2065 = vst [vmem:[%s4552_s11 + $0x40] sm:$0xff] %v2057_v9  ;;  %2089 = vst.msk [vmem:[%s4537_s18 + $0x40] sm:$0xff] %vm1888_vm0, %v2319_v49  ;;  %vm2026_vm8 = vcmp.lt.f32.partialorder %v4528_v37, %v2018_v20  ;;  %v1814_v56 = vsub.f32 %v4847_v44, %v4542_v10  ;;  %v1790_v58 = vpop.xlane.xlu1 %1789  ;;  %v1982_v11 = vadd.f32 %v689_v53, %v625_v8  ;;  %v2889_v8 = vld [vmem:[%s3299_s16 + $0x38] sm:$0xff] }
 0x6a5   : > { %v2058_v55 = vsel %vm2026_vm8, %v4848_v2, %v2034_v17  ;;  %v2320_v62 = vsel %vm2026_vm8, 1.0, %v3063_v35  ;;  %v1821_v63 = vsub.f32 %v1813_v4, %v1797_v21  ;;  %v1798_v47 = vmul.f32 0.5, %v1790_v58 }
 0x6a6   : > { %2066 = vst [vmem:[%s4552_s11 + $0x48] sm:$0xff] %v2058_v55  ;;  %2090 = vst.msk [vmem:[%s4537_s18 + $0x48] sm:$0xff] %vm1888_vm0, %v2320_v62  ;;  %v1784_v22 = vpop.xlane.xlu0 %1783  ;;  %v1989_v38 = vsub.f32 %v1981_v26, %v4602_v0  ;;  %v1983_v16 = vadd.f32 %v690_v61, %v626_v18  ;;  %v1990_v46 = vsub.f32 %v1982_v11, %v4618_v52  ;;  %v2891_v26 = vld [vmem:[%s3299_s16 + $0x28] sm:$0xff] }
 0x6a7   : > { %v1835_v36 = vmul.f32 1.442695, %v1821_v63  ;;  %v1822_v10 = vsub.f32 %v1814_v56, %v1798_v47  ;;  %v1795_v14 = vmul.f32 0.5, %v1784_v22  ;;  %v1984_v60 = vadd.f32 %v691_v57, %v627_v28  ;;  %v2888_v63 = vld [vmem:[%s3299_s16 + $0x30] sm:$0xff] }
 0x6a8   : > { %v1786_v42 = vpop.xlane.xlu1 %1785  ;;  %v1991_v9 = vsub.f32 %v1983_v16, %v4559_v34 }
 0x6a9   : > { %2860 = vpow2.f32 %v1835_v36  ;;  %v1837_v45 = vmul.f32 1.442695, %v1822_v10  ;;  %v1819_v30 = vsub.f32 %v1811_v24, %v1795_v14  ;;  %v1796_v12 = vmul.f32 0.5, %v1786_v42  ;;  %v2890_v10 = vld [vmem:[%s3299_s16 + $0x20] sm:$0xff]  ;;  %v2038_v42 = vld [vmem:[%s3299_s16 + $0x68] sm:$0xff] }
 0x6aa   : > { %v1962_v6 = vpop.xlane.xlu0 %1961  ;;  %v1992_v4 = vsub.f32 %v1984_v60, %v4564_v43 }
 0x6ab   : > { %2862 = vpow2.f32 %v1837_v45  ;;  %v1831_v39 = vmul.f32 1.442695, %v1819_v30  ;;  %v1820_v31 = vsub.f32 %v1812_v5, %v1796_v12  ;;  %v1973_v50 = vmul.f32 0.5, %v1962_v6 }
 0x6ac   : > { %v1964_v27 = vpop.xlane.xlu1 %1963 }
 0x6ad   : > { %2864 = vpow2.f32 %v1831_v39  ;;  %v1833_v33 = vmul.f32 1.442695, %v1820_v31  ;;  %v1997_v17 = vsub.f32 %v1989_v38, %v1973_v50  ;;  %v1974_v20 = vmul.f32 0.5, %v1964_v27 }
 0x6ae   : > { %v1966_v51 = vpop.xlane.xlu0 %1965 }
 0x6af   : > { %2866 = vpow2.f32 %v1833_v33  ;;  %v2009_v49 = vmul.f32 1.442695, %v1997_v17  ;;  %v1998_v0 = vsub.f32 %v1990_v46, %v1974_v20  ;;  %v1975_v41 = vmul.f32 0.5, %v1966_v51 }
 0x6b0   : > { %v1968_v21 = vpop.xlane.xlu1 %1967 }
 0x6b1   : > { %2868 = vpow2.f32 %v2009_v49  ;;  %v2011_v1 = vmul.f32 1.442695, %v1998_v0  ;;  %v1999_v52 = vsub.f32 %v1991_v9, %v1975_v41  ;;  %v1976_v13 = vmul.f32 0.5, %v1968_v21 }
 0x6b3   : > { %v2861_v44 = vpop.eup %2860  ;;  %2870 = vpow2.f32 %v2011_v1  ;;  %v2013_v56 = vmul.f32 1.442695, %v1999_v52  ;;  %v2000_v58 = vsub.f32 %v1992_v4, %v1976_v13 }
 0x6b4   : > { %v1845_v34 = vmin.f32 %v2861_v44, 1.0 }
 0x6b5   : > { %v2863_v2 = vpop.eup %2862  ;;  %2872 = vpow2.f32 %v2013_v56  ;;  %v2015_v55 = vmul.f32 1.442695, %v2000_v58 }
 0x6b6   : > { %vm1854_vm9 = vcmp.lt.f32.partialorder %v4528_v37, %v1845_v34  ;;  %v1846_v43 = vmin.f32 %v2863_v2, 1.0 }
 0x6b7   : > { %v2865_v62 = vpop.eup %2864  ;;  %v1878_v47 = vsel %vm1854_vm9, %v4393_v25, %v2888_v63  ;;  %v2317_v3 = vsel %vm1854_vm9, 1.0, %v3063_v35  ;;  %2874 = vpow2.f32 %v2015_v55 }
 0x6b8   : > { %1886 = vst [vmem:[%s4552_s11 + $0x30] sm:$0xff] %v1878_v47  ;;  %1911 = vst.msk [vmem:[%s4537_s18 + $0x30] sm:$0xff] %vm1888_vm0, %v2317_v3  ;;  %vm1855_vm10 = vcmp.lt.f32.partialorder %v4528_v37, %v1846_v43  ;;  %v1843_v53 = vmin.f32 %v2865_v62, 1.0 }
 0x6b9   : > { %v2867_v23 = vpop.eup %2866  ;;  %v1879_v22 = vsel %vm1855_vm10, %v4380_v19, %v2889_v8  ;;  %v2318_v25 = vsel %vm1855_vm10, 1.0, %v3063_v35  ;;  %v2037_v19 = vld [vmem:[%s3299_s16 + $0x60] sm:$0xff] }
 0x6ba   : > { %1887 = vst [vmem:[%s4552_s11 + $0x38] sm:$0xff] %v1879_v22  ;;  %1912 = vst.msk [vmem:[%s4537_s18 + $0x38] sm:$0xff] %vm1888_vm0, %v2318_v25  ;;  %vm1852_vm11 = vcmp.lt.f32.partialorder %v4528_v37, %v1843_v53  ;;  %v1844_v24 = vmin.f32 %v2867_v23, 1.0 }
 0x6bb   : > { %v2869_v36 = vpop.eup %2868  ;;  %v1876_v14 = vsel %vm1852_vm11, %v4387_v48, %v2890_v10  ;;  %v2315_v7 = vsel %vm1852_vm11, 1.0, %v3063_v35 }
 0x6bc   : > { %1884 = vst [vmem:[%s4552_s11 + $0x20] sm:$0xff] %v1876_v14  ;;  %1909 = vst.msk [vmem:[%s4537_s18 + $0x20] sm:$0xff] %vm1888_vm0, %v2315_v7  ;;  %vm1853_vm12 = vcmp.lt.f32.partialorder %v4528_v37, %v1844_v24  ;;  %v2021_v61 = vmin.f32 %v2869_v36, 1.0 }
 0x6bd   : > { %v2871_v18 = vpop.eup %2870  ;;  %v1877_v5 = vsel %vm1853_vm12, %v4390_v59, %v2891_v26  ;;  %v2316_v48 = vsel %vm1853_vm12, 1.0, %v3063_v35  ;;  %v2039_v59 = vld [vmem:[%s3299_s16 + $0x70] sm:$0xff] }
 0x6be   : > { %1885 = vst [vmem:[%s4552_s11 + $0x28] sm:$0xff] %v1877_v5  ;;  %1910 = vst.msk [vmem:[%s4537_s18 + $0x28] sm:$0xff] %vm1888_vm0, %v2316_v48  ;;  %vm2029_vm13 = vcmp.lt.f32.partialorder %v4528_v37, %v2021_v61  ;;  %v2022_v45 = vmin.f32 %v2871_v18, 1.0 }
 0x6bf   : > { %v2873_v30 = vpop.eup %2872  ;;  %v2061_v12 = vsel %vm2029_vm13, %v4400_v54, %v2037_v19  ;;  %v2323_v15 = vsel %vm2029_vm13, 1.0, %v3063_v35  ;;  %v2040_v54 = vld [vmem:[%s3299_s16 + $0x78] sm:$0xff]  ;;  %s2098_s16 = scalar_lea.sflag [#allocation6], %s3292_s3 }
 0x6c0   : > { %2069 = vst [vmem:[%s4552_s11 + $0x60] sm:$0xff] %v2061_v12  ;;  %2093 = vst.msk [vmem:[%s4537_s18 + $0x60] sm:$0xff] %vm1888_vm0, %v2323_v15  ;;  %vm2030_vm14 = vcmp.lt.f32.partialorder %v4528_v37, %v2022_v45  ;;  %v2023_v57 = vmin.f32 %v2873_v30, 1.0 }
 0x6c1   : > { %v2875_v28 = vpop.eup %2874  ;;  %v2062_v11 = vsel %vm2030_vm14, %v4406_v29, %v2038_v42  ;;  %v2324_v38 = vsel %vm2030_vm14, 1.0, %v3063_v35 }
 0x6c2   : > { %2070 = vst [vmem:[%s4552_s11 + $0x68] sm:$0xff] %v2062_v11  ;;  %2094 = vst.msk [vmem:[%s4537_s18 + $0x68] sm:$0xff] %vm1888_vm0, %v2324_v38  ;;  %vm2031_vm15 = vcmp.lt.f32.partialorder %v4528_v37, %v2023_v57  ;;  %v2024_v6 = vmin.f32 %v2875_v28, 1.0 }
 0x6c3   : > { %v2063_v39 = vsel %vm2031_vm15, %v4411_v40, %v2039_v59  ;;  %v2325_v31 = vsel %vm2031_vm15, 1.0, %v3063_v35 }
 0x6c4   : > { %2071 = vst [vmem:[%s4552_s11 + $0x70] sm:$0xff] %v2063_v39  ;;  %2095 = vst.msk [vmem:[%s4537_s18 + $0x70] sm:$0xff] %vm1888_vm0, %v2325_v31  ;;  %vm2032_vm1 = vcmp.lt.f32.partialorder %v4528_v37, %v2024_v6 }
 0x6c5   : > { %v2064_v29 = vsel %vm2032_vm1, %v4403_v32, %v2040_v54  ;;  %v2326_v40 = vsel %vm2032_vm1, 1.0, %v3063_v35 }
 0x6c6   : > { %2072 = vst [vmem:[%s4552_s11 + $0x78] sm:$0xff] %v2064_v29  ;;  %2096 = vst.msk [vmem:[%s4537_s18 + $0x78] sm:$0xff] %vm1888_vm0, %v2326_v40 }
 0x6c7   : > { %2993 = shalt.err (!%p2990_p8)
}
 0x6c8   : > { %s2994_s15 = scalar_lea.hbm %s4710_s1, 2048  ;;  %s2998_s20 = scalar_lea.hbm %s4769_s4, 4096 }
 0x6c9   : > { %p2995_p10 = scmp.ne.s32.totalorder %s4710_s1, %s2994_s15  ;;  %p2999_p11 = scmp.lt.u32.totalorder %s4710_s1, %s4769_s4 }
 0x6ca   : > { %p3000_p13 = scmp.lt.u32.totalorder %s2998_s20, %s2994_s15  ;;  %p3002_p7 = scmp.lt.u32.totalorder %s2994_s15, %s4710_s1 }
 0x6cb   : > { %p2996_p0 = pnand %p2995_p10, %p3196_p12 }
 0x6cc   : > { %p3001_p3 = por %p3000_p13, %p2999_p11 }
 0x6cd   : > { %p2997_p4 = pneg %p2996_p0 }
 0x6ce   : > { %p3003_p9 = por %p3002_p7, %p3001_p3 }
 0x6d0   : > { %p3004_p1 = pnand %p3003_p9, %p2997_p4 }
 0x6d2   : > { %3007 = shalt.err (!%p3004_p1)
}
 0x6d3   : > { %s3065_s18 = smov 128   ;;  %s3066_s11 = smov 8  }
 0x6d4   : > { %2775 = dma.vmem_to_hbm [thread:$0]  (%p3196_p12), %s4712_s8, 2048, %s4710_s1, %s2098_s16, %s3065_s18, %s3065_s18, %s3066_s11  }
 0x6d5 PF: > { %s2144_s27 = sand.u32 1, %s3042_s23   ;;  %p4852_p5 = scmp.ne.s32.totalorder %s4786_s29, 0 }
 0x6d6   : > { %p4853_p2 = scmp.ge.s32.totalorder %s3054_s26, 2  ;;  %s2145_s0 = scalar_lea.sflag [#allocation6], %s2144_s27 }
 0x6d8   : > { %p2789_p6 = pnand %p4853_p2, %p4852_p5 }
 0x6da   : > { %3037 = dma.done.wait (!%p2789_p6), %s2145_s0, 2048  }
 0x6db   : > { %3039 = vsyncadd (!%p2789_p6), %s2145_s0, 4294965248  ;;  %p24_p8 = scmp.ge.s32.totalorder %s3161_s10, 4   ;;  %s4854_s23 = smov %s3046_s24 }
 0x6dc   : > { %s4855_s24 = smov %s3050_s25  ;;  %s4856_s25 = smov %s3192_s13 }
 0x6dd   : > { %s4857_s26 = smov %s3161_s10  ;;  %26 = sbr.rel (!%p24_p8) target bundleno = 11 (0xb), region = 118 }
 0x6e4   :  { %2166 = vsyncpa [#allocation5], 1 }
 0x6e5   :  { %2168 = vsyncpa [#allocation5 + $0x1], 1 }
 0x6e6   :  { %2169 = vsyncpa [#allocation8], 1 }
 0x6e7   :  { %2171 = vsyncpa [#allocation8 + $0x1], 1 }
 0x6e8   :  { %2172 = vsyncpa [#allocation6], 1 }
 0x6e9   :  { %2174 = vsyncpa [#allocation6 + $0x1], 1 }

</bundles_post_ra>
